<compile_context>
chip_gen: v5e
topology: v5e:2x2
jax: 0.10.0
libtpu: 0.0.40
codegen_flags: <defaults>
</compile_context>

<pallas_src>
import functools

import jax
import jax.numpy as jnp
from jax.experimental import pallas as pl
from jax.experimental.pallas import tpu as pltpu


# ----------------------------- in-kernel helpers -----------------------------

def _layernorm(x, w_row, b_row, eps=1e-5):
    # x: (M, D) f32, w_row/b_row: (1, D) f32
    mu = jnp.mean(x, axis=-1, keepdims=True)
    var = jnp.mean((x - mu) ** 2, axis=-1, keepdims=True)
    return (x - mu) * jax.lax.rsqrt(var + eps) * w_row + b_row


def _quick_gelu(x):
    # CLIP activation: x * sigmoid(1.702 * x).  Kept in f32 (v5e has no bf16
    # VPU/EUP); the result is cast to bf16 before feeding the fc2 MXU matmul.
    return x * jax.nn.sigmoid(1.702 * x)


# --------------------------- CLIP encoder layer ----------------------------

def clip_layer_kernel(num_heads, fuse_final_ln,
                      x_ref, mask_ref,
                      ln1w, ln1b, wqkv, bqkv, ow, ob,
                      ln2w, ln2b, f1w, f1b, f2w, f2b,
                      *rest):
    if fuse_final_ln:
        flnw, flnb, y_ref, z_ref = rest
    else:
        (y_ref,) = rest

    Bt, S, D = x_ref.shape
    H = num_heads
    hd = D // H
    scale = float(hd) ** -0.5
    M = Bt * S

    x = x_ref[...].reshape(M, D)                        # f32 residual stream

    # ---- self-attention block (pre-LN) ----
    h = _layernorm(x, ln1w[...], ln1b[...])
    qkv = jnp.dot(h.astype(jnp.bfloat16), wqkv[...],
                  preferred_element_type=jnp.float32) + bqkv[...]   # (M, 3D) f32
    q = (qkv[:, :D] * scale).astype(jnp.bfloat16).reshape(Bt, S, D)
    k = qkv[:, D:2 * D].astype(jnp.bfloat16).reshape(Bt, S, D)
    v = qkv[:, 2 * D:].astype(jnp.bfloat16).reshape(Bt, S, D)

    # Multi-head attention batched over (head, batch-tile).
    # TODO(synk): a true (Bt,S,H,hd)->(Bt,H,S,hd) relayout needs a non-minormost
    # transpose which Mosaic does not lower; heads are folded into the einsum
    # batch axis via leading-dim concatenation of static lane slices instead.
    def split_heads(t):                                 # (Bt,S,D) -> (H*Bt,S,hd)
        return jnp.concatenate(
            [t[:, :, i * hd:(i + 1) * hd] for i in range(H)], axis=0)

    qh, kh, vh = split_heads(q), split_heads(k), split_heads(v)

    s = jnp.einsum('bqd,bkd->bqk', qh, kh,
                   preferred_element_type=jnp.float32)              # (H*Bt,S,S)
    s = s + mask_ref[...]                                           # causal mask
    s = s - jnp.max(s, axis=-1, keepdims=True)
    p = jnp.exp(s)
    p = p * pl.reciprocal(jnp.sum(p, axis=-1, keepdims=True), approx=True)
    ctx = jnp.einsum('bqk,bkd->bqd', p.astype(jnp.bfloat16), vh,
                     preferred_element_type=jnp.float32)            # (H*Bt,S,hd)

    # Merge heads back to (M, D) and run ONE output projection with K = D
    # (instead of H small K=hd matmuls that underfill the MXU contraction).
    ctx = jnp.concatenate([ctx[i * Bt:(i + 1) * Bt] for i in range(H)], axis=-1)
    attn = jnp.dot(ctx.reshape(M, D).astype(jnp.bfloat16), ow[...],
                   preferred_element_type=jnp.float32) + ob[...]
    x = x + attn

    # ---- MLP block (pre-LN, quick_gelu) ----
    h2 = _layernorm(x, ln2w[...], ln2b[...])
    ff = jnp.dot(h2.astype(jnp.bfloat16), f1w[...],
                 preferred_element_type=jnp.float32) + f1b[...]
    ff = _quick_gelu(ff)
    ff = jnp.dot(ff.astype(jnp.bfloat16), f2w[...],
                 preferred_element_type=jnp.float32) + f2b[...]
    y = x + ff

    y_ref[...] = y.reshape(Bt, S, D)
    if fuse_final_ln:
        # Final LayerNorm fused into the last layer's kernel: saves one full
        # (B, S, D) HBM round trip and one kernel launch.
        z_ref[...] = _layernorm(y, flnw[...], flnb[...]).reshape(Bt, S, D)


# ------------------------------ wrappers -----------------------------------

_VMEM_LIMIT = None
_BUFFERED1_OK = None


def _vmem_limit_bytes():
    """Generation-aware VMEM budget: ~96 MiB on 128 MiB chips (v5e/v6e), ~40 MiB
    on 64 MiB chips (v7x); conservative 48 MiB if the query is unavailable."""
    global _VMEM_LIMIT
    if _VMEM_LIMIT is not None:
        return _VMEM_LIMIT
    try:
        cap = int(pltpu.get_tpu_info().vmem_capacity_bytes)
    except Exception:
        cap = None
    if cap is None:
        _VMEM_LIMIT = 48 * 1024 * 1024
    elif cap >= 96 * 1024 * 1024:
        _VMEM_LIMIT = 96 * 1024 * 1024
    else:
        _VMEM_LIMIT = max(32 * 1024 * 1024, cap - 24 * 1024 * 1024)
    return _VMEM_LIMIT


def _buffered_const_ok():
    """Probe whether BlockSpec(pipeline_mode=pl.Buffered(1)) is supported, so
    grid-invariant constants are single-buffered (halves their VMEM footprint)."""
    global _BUFFERED1_OK
    if _BUFFERED1_OK is not None:
        return _BUFFERED1_OK

    def _probe_kernel(c_ref, x_ref, o_ref):
        o_ref[...] = x_ref[...] + c_ref[...]

    try:
        c = jnp.full((8, 128), 2.0, jnp.float32)
        x = jnp.arange(16 * 128, dtype=jnp.float32).reshape(16, 128)
        out = pl.pallas_call(
            _probe_kernel,
            out_shape=jax.ShapeDtypeStruct((16, 128), jnp.float32),
            grid=(2,),
            in_specs=[pl.BlockSpec((8, 128), lambda i: (0, 0),
                                   pipeline_mode=pl.Buffered(1)),
                      pl.BlockSpec((8, 128), lambda i: (i, 0))],
            out_specs=pl.BlockSpec((8, 128), lambda i: (i, 0)),
        )(c, x)
        jax.block_until_ready(out)
        _BUFFERED1_OK = bool(jnp.allclose(out, x + 2.0))
    except Exception:
        _BUFFERED1_OK = False
    return _BUFFERED1_OK


def _const_spec(arr):
    """BlockSpec for a grid-invariant input (weights / biases / mask)."""
    nd = arr.ndim
    idx = lambda i, _n=nd: (0,) * _n
    if _buffered_const_ok():
        return pl.BlockSpec(arr.shape, idx, pipeline_mode=pl.Buffered(1))
    return pl.BlockSpec(arr.shape, idx)


def _pick_batch_tile(B, S, D, I, H, vmem_limit):
    """Largest divisor of B whose f32 temporaries fit ~1/3 of the VMEM budget,
    while keeping >= 2 grid steps (so both v7x TensorCores get work)."""
    # per activation row: qkv(3D) + ff(I) + residual/LN/attn(~5D) + scores(~2*H*S)
    row_bytes = 4 * (8 * D + I + 2 * H * S)
    max_rows = max(S, (vmem_limit // 3) // row_bytes)
    cap = B // 2 if B >= 2 else B
    bt = 1
    for cand in range(1, cap + 1):
        if B % cand == 0 and cand * S <= max_rows:
            bt = cand
    return bt


def _causal_mask(S):
    row = jnp.arange(S, dtype=jnp.int32)[:, None]
    col = jnp.arange(S, dtype=jnp.int32)[None, :]
    neg = jnp.finfo(jnp.float32).min
    return jnp.where(col <= row, 0.0, neg).astype(jnp.float32)


def clip_layer_pallas(x, mask, p, num_heads, final_ln=None):
    B, S, D = x.shape
    I = p["fc1_w"].shape[1]
    vmem_limit = _vmem_limit_bytes()
    bt = _pick_batch_tile(B, S, D, I, num_heads, vmem_limit)

    args = [x, mask,
            p["ln1_w"], p["ln1_b"], p["qkv_w"], p["qkv_b"], p["o_w"], p["o_b"],
            p["ln2_w"], p["ln2_b"], p["fc1_w"], p["fc1_b"], p["fc2_w"], p["fc2_b"]]
    fuse = final_ln is not None
    if fuse:
        args += [final_ln[0], final_ln[1]]

    act_spec = pl.BlockSpec((bt, S, D), lambda i: (i, 0, 0))
    in_specs = [act_spec] + [_const_spec(a) for a in args[1:]]
    if fuse:
        out_shape = (jax.ShapeDtypeStruct((B, S, D), jnp.float32),
                     jax.ShapeDtypeStruct((B, S, D), jnp.float32))
        out_specs = (pl.BlockSpec((bt, S, D), lambda i: (i, 0, 0)),
                     pl.BlockSpec((bt, S, D), lambda i: (i, 0, 0)))
    else:
        out_shape = jax.ShapeDtypeStruct((B, S, D), jnp.float32)
        out_specs = pl.BlockSpec((bt, S, D), lambda i: (i, 0, 0))

    # TODO(synk): for D>=1024 CLIP variants on v7x, stream qkv_w/fc1_w/fc2_w over an
    # extra 'arbitrary' grid axis (weight tiling), and on v5e prefetch the next
    # layer's weights across calls (P10); not needed for CLIP-B/L sizes here.
    return pl.pallas_call(
        functools.partial(clip_layer_kernel, num_heads, fuse),
        out_shape=out_shape,
        grid=(B // bt,),
        in_specs=in_specs,
        out_specs=out_specs,
        compiler_params=pltpu.CompilerParams(
            dimension_semantics=("parallel",),
            vmem_limit_bytes=vmem_limit),
    )(*args)


def clip_text_encoder_forward(input_ids, params, num_heads):
    """Returns (last_hidden_state, pooled_output, hidden_states) matching
    CLIPTextModel(input_ids, output_hidden_states=True, return_dict=False)."""
    B, S = input_ids.shape
    # TODO(synk): token-embedding gather is a data-dependent gather; kept in JAX.
    tok = jnp.take(params["token_emb"], input_ids, axis=0)          # (B, S, D)
    pos = params["pos_emb"][:S][None, :, :]                         # (1, S, D)
    hidden = (tok + pos).astype(jnp.float32)

    mask = _causal_mask(S)                                          # built once

    hidden_states = (hidden,)
    layers = params["layers"]
    assert len(layers) >= 1
    last = None
    for li, lp in enumerate(layers):
        if li == len(layers) - 1:
            hidden, last = clip_layer_pallas(
                hidden, mask, lp, num_heads,
                final_ln=(params["final_ln_w"], params["final_ln_b"]))
        else:
            hidden = clip_layer_pallas(hidden, mask, lp, num_heads)
        hidden_states = hidden_states + (hidden,)

    # CLIP pooled output: hidden state at the EOS position (argmax-of-ids
    # heuristic of the original CLIPTextModel).  Data-dependent gather in JAX.
    eos_idx = jnp.argmax(input_ids, axis=-1)
    pooled = last[jnp.arange(B), eos_idx]                           # (B, D)

    return (last, pooled, hidden_states)


# --------------------------- deterministic init -----------------------------

def init_params(key, vocab, max_pos, D, I, L):
    """Weights stored in deployment layout: matmul weights bf16 (in, out),
    Q/K/V pre-fused into (D, 3D); LN params and biases kept f32 as (1, N) rows."""
    def row(a):
        return a.reshape(1, -1)

    keys = jax.random.split(key, 2 + L)
    params = {
        "token_emb": 0.02 * jax.random.normal(keys[0], (vocab, D), jnp.float32),
        "pos_emb": 0.02 * jax.random.normal(keys[1], (max_pos, D), jnp.float32),
        "final_ln_w": row(jnp.ones((D,), jnp.float32)),
        "final_ln_b": row(jnp.zeros((D,), jnp.float32)),
        "layers": [],
    }
    for l in range(L):
        lk = jax.random.split(keys[2 + l], 6)
        qw = 0.02 * jax.random.normal(lk[0], (D, D), jnp.float32)
        kw = 0.02 * jax.random.normal(lk[1], (D, D), jnp.float32)
        vw = 0.02 * jax.random.normal(lk[2], (D, D), jnp.float32)
        layer = {
            "ln1_w": row(jnp.ones((D,), jnp.float32)),
            "ln1_b": row(jnp.zeros((D,), jnp.float32)),
            "qkv_w": jnp.concatenate([qw, kw, vw], axis=1).astype(jnp.bfloat16),
            "qkv_b": row(jnp.zeros((3 * D,), jnp.float32)),
            "o_w": (0.02 * jax.random.normal(lk[3], (D, D), jnp.float32)
                    ).astype(jnp.bfloat16),
            "o_b": row(jnp.zeros((D,), jnp.float32)),
            "ln2_w": row(jnp.ones((D,), jnp.float32)),
            "ln2_b": row(jnp.zeros((D,), jnp.float32)),
            "fc1_w": (0.02 * jax.random.normal(lk[4], (D, I), jnp.float32)
                      ).astype(jnp.bfloat16),
            "fc1_b": row(jnp.zeros((I,), jnp.float32)),
            "fc2_w": (0.02 * jax.random.normal(lk[5], (I, D), jnp.float32)
                      ).astype(jnp.bfloat16),
            "fc2_b": row(jnp.zeros((D,), jnp.float32)),
        }
        params["layers"].append(layer)
    return params


# --------------------------------- main -------------------------------------

if __name__ == "__main__":
    B, S = 2, 16            # batch, seq (= max_position_embeddings)
    D, H, I = 128, 4, 512   # hidden (full 128-lane tile), heads, intermediate
    L, V = 2, 96            # layers, vocab

    key = jax.random.PRNGKey(0)
    kp, ki = jax.random.split(key)
    params = init_params(kp, V, S, D, I, L)
    input_ids = jax.random.randint(ki, (B, S), 0, V, dtype=jnp.int32)

    last_hidden, pooled, hidden_states = clip_text_encoder_forward(
        input_ids, params, H)
    jax.block_until_ready((last_hidden, pooled, hidden_states))

    assert last_hidden.shape == (B, S, D)
    assert pooled.shape == (B, D)
    assert len(hidden_states) == L + 1
    assert all(hs.shape == (B, S, D) for hs in hidden_states)
    assert bool(jnp.all(jnp.isfinite(last_hidden)))

    print("KERNEL_OK")
</pallas_src>

<mosaic_0001>
module attributes {stable_mosaic.version = 11 : i64} {
  func.func @_probe_kernel(%arg0: i32, %arg1: memref<8x128xf32, #tpu.memory_space<vmem>>, %arg2: memref<8x128xf32, #tpu.memory_space<vmem>>, %arg3: memref<8x128xf32, #tpu.memory_space<vmem>>) attributes {dimension_semantics = [#tpu.dimension_semantics<arbitrary>], iteration_bounds = array<i64: 2>, scalar_prefetch = 0 : i64, scratch_operands = 0 : i64, tpu.core_type = #tpu.core_type<tc>, window_params = [{pipeline_mode = #tpu.pipeline_mode<synchronous>, transform_indices = @transform_0, window_bounds = array<i64: 8, 128>}, {transform_indices = @transform_1, window_bounds = array<i64: 8, 128>}, {transform_indices = @transform_2, window_bounds = array<i64: 8, 128>}]} {
    %c0 = arith.constant 0 : index
    %c0_0 = arith.constant 0 : index
    %0 = vector.load %arg2[%c0, %c0_0] : memref<8x128xf32, #tpu.memory_space<vmem>>, vector<8x128xf32>
    %c0_1 = arith.constant 0 : index
    %c0_2 = arith.constant 0 : index
    %1 = vector.load %arg1[%c0_1, %c0_2] : memref<8x128xf32, #tpu.memory_space<vmem>>, vector<8x128xf32>
    %2 = arith.addf %0, %1 : vector<8x128xf32>
    %c0_3 = arith.constant 0 : index
    %c0_4 = arith.constant 0 : index
    %3 = vector.load %arg3[%c0_3, %c0_4] : memref<8x128xf32, #tpu.memory_space<vmem>>, vector<8x128xf32>
    tpu.vector_store %arg3[%c0_3, %c0_4], %2 {strides = array<i32>} : memref<8x128xf32, #tpu.memory_space<vmem>>, vector<8x128xf32>,
    return
  }
  func.func @transform_0(%arg0: i32) -> (i32, i32) {
    %c0_i32 = arith.constant 0 : i32
    %c0_i32_0 = arith.constant 0 : i32
    %c0_i32_1 = arith.constant 0 : i32
    return %c0_i32, %c0_i32_0 : i32, i32
  }
  func.func @transform_1(%arg0: i32) -> (i32, i32) {
    %c0_i32 = arith.constant 0 : i32
    %c0_i32_0 = arith.constant 0 : i32
    return %arg0, %c0_i32 : i32, i32
  }
  func.func @transform_2(%arg0: i32) -> (i32, i32) {
    %c0_i32 = arith.constant 0 : i32
    %c0_i32_0 = arith.constant 0 : i32
    return %arg0, %c0_i32 : i32, i32
  }
}

module attributes {stable_mosaic.version = 11 : i64} {
  func.func @clip_layer_kernel(%arg0: i32, %arg1: memref<1x16x128xf32, #tpu.memory_space<vmem>>, %arg2: memref<16x16xf32, #tpu.memory_space<vmem>>, %arg3: memref<1x128xf32, #tpu.memory_space<vmem>>, %arg4: memref<1x128xf32, #tpu.memory_space<vmem>>, %arg5: memref<128x384xbf16, #tpu.memory_space<vmem>>, %arg6: memref<1x384xf32, #tpu.memory_space<vmem>>, %arg7: memref<128x128xbf16, #tpu.memory_space<vmem>>, %arg8: memref<1x128xf32, #tpu.memory_space<vmem>>, %arg9: memref<1x128xf32, #tpu.memory_space<vmem>>, %arg10: memref<1x128xf32, #tpu.memory_space<vmem>>, %arg11: memref<128x512xbf16, #tpu.memory_space<vmem>>, %arg12: memref<1x512xf32, #tpu.memory_space<vmem>>, %arg13: memref<512x128xbf16, #tpu.memory_space<vmem>>, %arg14: memref<1x128xf32, #tpu.memory_space<vmem>>, %arg15: memref<1x16x128xf32, #tpu.memory_space<vmem>>) attributes {dimension_semantics = [#tpu.dimension_semantics<parallel>], iteration_bounds = array<i64: 2>, scalar_prefetch = 0 : i64, scratch_operands = 0 : i64, tpu.core_type = #tpu.core_type<tc>, window_params = [{transform_indices = @transform_0, window_bounds = array<i64: 1, 16, 128>}, {pipeline_mode = #tpu.pipeline_mode<synchronous>, transform_indices = @transform_1, window_bounds = array<i64: 16, 16>}, {pipeline_mode = #tpu.pipeline_mode<synchronous>, transform_indices = @transform_2, window_bounds = array<i64: 1, 128>}, {pipeline_mode = #tpu.pipeline_mode<synchronous>, transform_indices = @transform_3, window_bounds = array<i64: 1, 128>}, {pipeline_mode = #tpu.pipeline_mode<synchronous>, transform_indices = @transform_4, window_bounds = array<i64: 128, 384>}, {pipeline_mode = #tpu.pipeline_mode<synchronous>, transform_indices = @transform_5, window_bounds = array<i64: 1, 384>}, {pipeline_mode = #tpu.pipeline_mode<synchronous>, transform_indices = @transform_6, window_bounds = array<i64: 128, 128>}, {pipeline_mode = #tpu.pipeline_mode<synchronous>, transform_indices = @transform_7, window_bounds = array<i64: 1, 128>}, {pipeline_mode = #tpu.pipeline_mode<synchronous>, transform_indices = @transform_8, window_bounds = array<i64: 1, 128>}, {pipeline_mode = #tpu.pipeline_mode<synchronous>, transform_indices = @transform_9, window_bounds = array<i64: 1, 128>}, {pipeline_mode = #tpu.pipeline_mode<synchronous>, transform_indices = @transform_10, window_bounds = array<i64: 128, 512>}, {pipeline_mode = #tpu.pipeline_mode<synchronous>, transform_indices = @transform_11, window_bounds = array<i64: 1, 512>}, {pipeline_mode = #tpu.pipeline_mode<synchronous>, transform_indices = @transform_12, window_bounds = array<i64: 512, 128>}, {pipeline_mode = #tpu.pipeline_mode<synchronous>, transform_indices = @transform_13, window_bounds = array<i64: 1, 128>}, {transform_indices = @transform_14, window_bounds = array<i64: 1, 16, 128>}]} {
    %c0 = arith.constant 0 : index
    %c0_0 = arith.constant 0 : index
    %c0_1 = arith.constant 0 : index
    %0 = vector.load %arg1[%c0, %c0_0, %c0_1] : memref<1x16x128xf32, #tpu.memory_space<vmem>>, vector<1x16x128xf32>
    %1 = vector.shape_cast %0 : vector<1x16x128xf32> to vector<16x128xf32>
    %c0_2 = arith.constant 0 : index
    %c0_3 = arith.constant 0 : index
    %2 = vector.load %arg3[%c0_2, %c0_3] : memref<1x128xf32, #tpu.memory_space<vmem>>, vector<1x128xf32>
    %c0_4 = arith.constant 0 : index
    %c0_5 = arith.constant 0 : index
    %3 = vector.load %arg4[%c0_4, %c0_5] : memref<1x128xf32, #tpu.memory_space<vmem>>, vector<1x128xf32>
    %cst = arith.constant dense<0.000000e+00> : vector<16xf32>
    %4 = vector.multi_reduction <add>, %1, %cst [1] : vector<16x128xf32> to vector<16xf32>
    %5 = vector.shape_cast %4 : vector<16xf32> to vector<16x1xf32>
    %cst_6 = arith.constant 1.280000e+02 : f32
    %6 = vector.broadcast %cst_6 : f32 to vector<16x1xf32>
    %7 = arith.divf %5, %6 : vector<16x1xf32>
    %8 = vector.broadcast %7 : vector<16x1xf32> to vector<16x128xf32>
    %9 = arith.subf %1, %8 : vector<16x128xf32>
    %10 = arith.mulf %9, %9 : vector<16x128xf32>
    %cst_7 = arith.constant dense<0.000000e+00> : vector<16xf32>
    %11 = vector.multi_reduction <add>, %10, %cst_7 [1] : vector<16x128xf32> to vector<16xf32>
    %12 = vector.shape_cast %11 : vector<16xf32> to vector<16x1xf32>
    %cst_8 = arith.constant 1.280000e+02 : f32
    %13 = vector.broadcast %cst_8 : f32 to vector<16x1xf32>
    %14 = arith.divf %12, %13 : vector<16x1xf32>
    %15 = vector.broadcast %7 : vector<16x1xf32> to vector<16x128xf32>
    %16 = arith.subf %1, %15 : vector<16x128xf32>
    %cst_9 = arith.constant 9.99999974E-6 : f32
    %17 = vector.broadcast %cst_9 : f32 to vector<16x1xf32>
    %18 = arith.addf %14, %17 : vector<16x1xf32>
    %19 = math.rsqrt %18 : vector<16x1xf32>
    %20 = vector.broadcast %19 : vector<16x1xf32> to vector<16x128xf32>
    %21 = arith.mulf %16, %20 : vector<16x128xf32>
    %22 = vector.broadcast %2 : vector<1x128xf32> to vector<16x128xf32>
    %23 = arith.mulf %21, %22 : vector<16x128xf32>
    %24 = vector.broadcast %3 : vector<1x128xf32> to vector<16x128xf32>
    %25 = arith.addf %23, %24 : vector<16x128xf32>
    %26 = arith.truncf %25 : vector<16x128xf32> to vector<16x128xbf16>
    %c0_10 = arith.constant 0 : index
    %c0_11 = arith.constant 0 : index
    %27 = vector.load %arg5[%c0_10, %c0_11] : memref<128x384xbf16, #tpu.memory_space<vmem>>, vector<128x384xbf16>
    %cst_12 = arith.constant dense<0.000000e+00> : vector<16x384xf32>
    %28 = tpu.matmul %26, %27, %cst_12 {dimension_numbers = #tpu.dot_dimension_numbers<[1], [0], [0], [1], [0, 0, 1, 1], [], []>} : vector<16x128xbf16>, vector<128x384xbf16>, vector<16x384xf32> -> vector<16x384xf32>
    %c0_13 = arith.constant 0 : index
    %c0_14 = arith.constant 0 : index
    %29 = vector.load %arg6[%c0_13, %c0_14] : memref<1x384xf32, #tpu.memory_space<vmem>>, vector<1x384xf32>
    %30 = vector.broadcast %29 : vector<1x384xf32> to vector<16x384xf32>
    %31 = arith.addf %28, %30 : vector<16x384xf32>
    %32 = vector.extract_strided_slice %31 {offsets = [0, 0], sizes = [16, 128], strides = [1, 1]} : vector<16x384xf32> to vector<16x128xf32>
    %cst_15 = arith.constant 0.176776692 : f32
    %33 = vector.broadcast %cst_15 : f32 to vector<16x128xf32>
    %34 = arith.mulf %32, %33 : vector<16x128xf32>
    %35 = arith.truncf %34 : vector<16x128xf32> to vector<16x128xbf16>
    %36 = vector.shape_cast %35 : vector<16x128xbf16> to vector<1x16x128xbf16>
    %37 = vector.extract_strided_slice %31 {offsets = [0, 128], sizes = [16, 128], strides = [1, 1]} : vector<16x384xf32> to vector<16x128xf32>
    %38 = arith.truncf %37 : vector<16x128xf32> to vector<16x128xbf16>
    %39 = vector.shape_cast %38 : vector<16x128xbf16> to vector<1x16x128xbf16>
    %40 = vector.extract_strided_slice %31 {offsets = [0, 256], sizes = [16, 128], strides = [1, 1]} : vector<16x384xf32> to vector<16x128xf32>
    %41 = arith.truncf %40 : vector<16x128xf32> to vector<16x128xbf16>
    %42 = vector.shape_cast %41 : vector<16x128xbf16> to vector<1x16x128xbf16>
    %43 = vector.extract_strided_slice %36 {offsets = [0, 0, 0], sizes = [1, 16, 32], strides = [1, 1, 1]} : vector<1x16x128xbf16> to vector<1x16x32xbf16>
    %44 = vector.extract_strided_slice %36 {offsets = [0, 0, 32], sizes = [1, 16, 32], strides = [1, 1, 1]} : vector<1x16x128xbf16> to vector<1x16x32xbf16>
    %45 = vector.extract_strided_slice %36 {offsets = [0, 0, 64], sizes = [1, 16, 32], strides = [1, 1, 1]} : vector<1x16x128xbf16> to vector<1x16x32xbf16>
    %46 = vector.extract_strided_slice %36 {offsets = [0, 0, 96], sizes = [1, 16, 32], strides = [1, 1, 1]} : vector<1x16x128xbf16> to vector<1x16x32xbf16>
    %47 = tpu.concatenate %43, %44, %45, %46 in 0 : vector<1x16x32xbf16>, vector<1x16x32xbf16>, vector<1x16x32xbf16>, vector<1x16x32xbf16> -> vector<4x16x32xbf16>
    %48 = vector.extract_strided_slice %39 {offsets = [0, 0, 0], sizes = [1, 16, 32], strides = [1, 1, 1]} : vector<1x16x128xbf16> to vector<1x16x32xbf16>
    %49 = vector.extract_strided_slice %39 {offsets = [0, 0, 32], sizes = [1, 16, 32], strides = [1, 1, 1]} : vector<1x16x128xbf16> to vector<1x16x32xbf16>
    %50 = vector.extract_strided_slice %39 {offsets = [0, 0, 64], sizes = [1, 16, 32], strides = [1, 1, 1]} : vector<1x16x128xbf16> to vector<1x16x32xbf16>
    %51 = vector.extract_strided_slice %39 {offsets = [0, 0, 96], sizes = [1, 16, 32], strides = [1, 1, 1]} : vector<1x16x128xbf16> to vector<1x16x32xbf16>
    %52 = tpu.concatenate %48, %49, %50, %51 in 0 : vector<1x16x32xbf16>, vector<1x16x32xbf16>, vector<1x16x32xbf16>, vector<1x16x32xbf16> -> vector<4x16x32xbf16>
    %53 = vector.extract_strided_slice %42 {offsets = [0, 0, 0], sizes = [1, 16, 32], strides = [1, 1, 1]} : vector<1x16x128xbf16> to vector<1x16x32xbf16>
    %54 = vector.extract_strided_slice %42 {offsets = [0, 0, 32], sizes = [1, 16, 32], strides = [1, 1, 1]} : vector<1x16x128xbf16> to vector<1x16x32xbf16>
    %55 = vector.extract_strided_slice %42 {offsets = [0, 0, 64], sizes = [1, 16, 32], strides = [1, 1, 1]} : vector<1x16x128xbf16> to vector<1x16x32xbf16>
    %56 = vector.extract_strided_slice %42 {offsets = [0, 0, 96], sizes = [1, 16, 32], strides = [1, 1, 1]} : vector<1x16x128xbf16> to vector<1x16x32xbf16>
    %57 = tpu.concatenate %53, %54, %55, %56 in 0 : vector<1x16x32xbf16>, vector<1x16x32xbf16>, vector<1x16x32xbf16>, vector<1x16x32xbf16> -> vector<4x16x32xbf16>
    "tpu.trace_start"() <{level = 10 : i32, message = "bqd,bkd->bqk"}> : () -> ()
    %cst_16 = arith.constant dense<0.000000e+00> : vector<4x16x16xf32>
    %58 = tpu.matmul %47, %52, %cst_16 {dimension_numbers = #tpu.dot_dimension_numbers<[2], [2], [1], [1], [0, 0, 0, 1, 1, 1], [0], [0]>} : vector<4x16x32xbf16>, vector<4x16x32xbf16>, vector<4x16x16xf32> -> vector<4x16x16xf32>
    "tpu.trace_stop"() : () -> ()
    %c0_17 = arith.constant 0 : index
    %c0_18 = arith.constant 0 : index
    %59 = vector.load %arg2[%c0_17, %c0_18] : memref<16x16xf32, #tpu.memory_space<vmem>>, vector<16x16xf32>
    %60 = vector.shape_cast %59 : vector<16x16xf32> to vector<1x16x16xf32>
    %61 = vector.broadcast %60 : vector<1x16x16xf32> to vector<4x16x16xf32>
    %62 = arith.addf %58, %61 : vector<4x16x16xf32>
    %cst_19 = arith.constant dense<0xFF800000> : vector<4x16xf32>
    %63 = vector.multi_reduction <maximumf>, %62, %cst_19 [2] : vector<4x16x16xf32> to vector<4x16xf32>
    %64 = vector.shape_cast %63 : vector<4x16xf32> to vector<4x16x1xf32>
    %65 = vector.broadcast %64 : vector<4x16x1xf32> to vector<4x16x16xf32>
    %66 = arith.subf %62, %65 : vector<4x16x16xf32>
    %67 = math.exp %66 : vector<4x16x16xf32>
    %cst_20 = arith.constant dense<0.000000e+00> : vector<4x16xf32>
    %68 = vector.multi_reduction <add>, %67, %cst_20 [2] : vector<4x16x16xf32> to vector<4x16xf32>
    %69 = vector.shape_cast %68 : vector<4x16xf32> to vector<4x16x1xf32>
    %70 = tpu.reciprocal %69 {approx = true} : vector<4x16x1xf32> -> vector<4x16x1xf32>
    %71 = vector.broadcast %70 : vector<4x16x1xf32> to vector<4x16x16xf32>
    %72 = arith.mulf %67, %71 : vector<4x16x16xf32>
    %73 = arith.truncf %72 : vector<4x16x16xf32> to vector<4x16x16xbf16>
    "tpu.trace_start"() <{level = 10 : i32, message = "bqk,bkd->bqd"}> : () -> ()
    %cst_21 = arith.constant dense<0.000000e+00> : vector<4x16x32xf32>
    %74 = tpu.matmul %73, %57, %cst_21 {dimension_numbers = #tpu.dot_dimension_numbers<[2], [1], [1], [2], [0, 0, 0, 1, 1, 2], [0], [0]>} : vector<4x16x16xbf16>, vector<4x16x32xbf16>, vector<4x16x32xf32> -> vector<4x16x32xf32>
    "tpu.trace_stop"() : () -> ()
    %75 = vector.extract_strided_slice %74 {offsets = [0, 0, 0], sizes = [1, 16, 32], strides = [1, 1, 1]} : vector<4x16x32xf32> to vector<1x16x32xf32>
    %76 = vector.extract_strided_slice %74 {offsets = [1, 0, 0], sizes = [1, 16, 32], strides = [1, 1, 1]} : vector<4x16x32xf32> to vector<1x16x32xf32>
    %77 = vector.extract_strided_slice %74 {offsets = [2, 0, 0], sizes = [1, 16, 32], strides = [1, 1, 1]} : vector<4x16x32xf32> to vector<1x16x32xf32>
    %78 = vector.extract_strided_slice %74 {offsets = [3, 0, 0], sizes = [1, 16, 32], strides = [1, 1, 1]} : vector<4x16x32xf32> to vector<1x16x32xf32>
    %79 = tpu.concatenate %75, %76, %77, %78 in 2 : vector<1x16x32xf32>, vector<1x16x32xf32>, vector<1x16x32xf32>, vector<1x16x32xf32> -> vector<1x16x128xf32>
    %80 = vector.shape_cast %79 : vector<1x16x128xf32> to vector<16x128xf32>
    %81 = arith.truncf %80 : vector<16x128xf32> to vector<16x128xbf16>
    %c0_22 = arith.constant 0 : index
    %c0_23 = arith.constant 0 : index
    %82 = vector.load %arg7[%c0_22, %c0_23] : memref<128x128xbf16, #tpu.memory_space<vmem>>, vector<128x128xbf16>
    %cst_24 = arith.constant dense<0.000000e+00> : vector<16x128xf32>
    %83 = tpu.matmul %81, %82, %cst_24 {dimension_numbers = #tpu.dot_dimension_numbers<[1], [0], [0], [1], [0, 0, 1, 1], [], []>} : vector<16x128xbf16>, vector<128x128xbf16>, vector<16x128xf32> -> vector<16x128xf32>
    %c0_25 = arith.constant 0 : index
    %c0_26 = arith.constant 0 : index
    %84 = vector.load %arg8[%c0_25, %c0_26] : memref<1x128xf32, #tpu.memory_space<vmem>>, vector<1x128xf32>
    %85 = vector.broadcast %84 : vector<1x128xf32> to vector<16x128xf32>
    %86 = arith.addf %83, %85 : vector<16x128xf32>
    %87 = arith.addf %1, %86 : vector<16x128xf32>
    %c0_27 = arith.constant 0 : index
    %c0_28 = arith.constant 0 : index
    %88 = vector.load %arg9[%c0_27, %c0_28] : memref<1x128xf32, #tpu.memory_space<vmem>>, vector<1x128xf32>
    %c0_29 = arith.constant 0 : index
    %c0_30 = arith.constant 0 : index
    %89 = vector.load %arg10[%c0_29, %c0_30] : memref<1x128xf32, #tpu.memory_space<vmem>>, vector<1x128xf32>
    %cst_31 = arith.constant dense<0.000000e+00> : vector<16xf32>
    %90 = vector.multi_reduction <add>, %87, %cst_31 [1] : vector<16x128xf32> to vector<16xf32>
    %91 = vector.shape_cast %90 : vector<16xf32> to vector<16x1xf32>
    %cst_32 = arith.constant 1.280000e+02 : f32
    %92 = vector.broadcast %cst_32 : f32 to vector<16x1xf32>
    %93 = arith.divf %91, %92 : vector<16x1xf32>
    %94 = vector.broadcast %93 : vector<16x1xf32> to vector<16x128xf32>
    %95 = arith.subf %87, %94 : vector<16x128xf32>
    %96 = arith.mulf %95, %95 : vector<16x128xf32>
    %cst_33 = arith.constant dense<0.000000e+00> : vector<16xf32>
    %97 = vector.multi_reduction <add>, %96, %cst_33 [1] : vector<16x128xf32> to vector<16xf32>
    %98 = vector.shape_cast %97 : vector<16xf32> to vector<16x1xf32>
    %cst_34 = arith.constant 1.280000e+02 : f32
    %99 = vector.broadcast %cst_34 : f32 to vector<16x1xf32>
    %100 = arith.divf %98, %99 : vector<16x1xf32>
    %101 = vector.broadcast %93 : vector<16x1xf32> to vector<16x128xf32>
    %102 = arith.subf %87, %101 : vector<16x128xf32>
    %cst_35 = arith.constant 9.99999974E-6 : f32
    %103 = vector.broadcast %cst_35 : f32 to vector<16x1xf32>
    %104 = arith.addf %100, %103 : vector<16x1xf32>
    %105 = math.rsqrt %104 : vector<16x1xf32>
    %106 = vector.broadcast %105 : vector<16x1xf32> to vector<16x128xf32>
    %107 = arith.mulf %102, %106 : vector<16x128xf32>
    %108 = vector.broadcast %88 : vector<1x128xf32> to vector<16x128xf32>
    %109 = arith.mulf %107, %108 : vector<16x128xf32>
    %110 = vector.broadcast %89 : vector<1x128xf32> to vector<16x128xf32>
    %111 = arith.addf %109, %110 : vector<16x128xf32>
    %112 = arith.truncf %111 : vector<16x128xf32> to vector<16x128xbf16>
    %c0_36 = arith.constant 0 : index
    %c0_37 = arith.constant 0 : index
    %113 = vector.load %arg11[%c0_36, %c0_37] : memref<128x512xbf16, #tpu.memory_space<vmem>>, vector<128x512xbf16>
    %cst_38 = arith.constant dense<0.000000e+00> : vector<16x512xf32>
    %114 = tpu.matmul %112, %113, %cst_38 {dimension_numbers = #tpu.dot_dimension_numbers<[1], [0], [0], [1], [0, 0, 1, 1], [], []>} : vector<16x128xbf16>, vector<128x512xbf16>, vector<16x512xf32> -> vector<16x512xf32>
    %c0_39 = arith.constant 0 : index
    %c0_40 = arith.constant 0 : index
    %115 = vector.load %arg12[%c0_39, %c0_40] : memref<1x512xf32, #tpu.memory_space<vmem>>, vector<1x512xf32>
    %116 = vector.broadcast %115 : vector<1x512xf32> to vector<16x512xf32>
    %117 = arith.addf %114, %116 : vector<16x512xf32>
    %cst_41 = arith.constant 1.702000e+00 : f32
    %118 = vector.broadcast %cst_41 : f32 to vector<16x512xf32>
    %119 = arith.mulf %118, %117 : vector<16x512xf32>
    %120 = arith.negf %119 : vector<16x512xf32>
    %121 = math.exp %120 : vector<16x512xf32>
    %cst_42 = arith.constant 1.000000e+00 : f32
    %122 = vector.broadcast %cst_42 : f32 to vector<16x512xf32>
    %123 = arith.addf %122, %121 : vector<16x512xf32>
    %124 = arith.divf %122, %123 : vector<16x512xf32>
    %125 = arith.mulf %117, %124 : vector<16x512xf32>
    %126 = arith.truncf %125 : vector<16x512xf32> to vector<16x512xbf16>
    %c0_43 = arith.constant 0 : index
    %c0_44 = arith.constant 0 : index
    %127 = vector.load %arg13[%c0_43, %c0_44] : memref<512x128xbf16, #tpu.memory_space<vmem>>, vector<512x128xbf16>
    %cst_45 = arith.constant dense<0.000000e+00> : vector<16x128xf32>
    %128 = tpu.matmul %126, %127, %cst_45 {dimension_numbers = #tpu.dot_dimension_numbers<[1], [0], [0], [1], [0, 0, 1, 1], [], []>} : vector<16x512xbf16>, vector<512x128xbf16>, vector<16x128xf32> -> vector<16x128xf32>
    %c0_46 = arith.constant 0 : index
    %c0_47 = arith.constant 0 : index
    %129 = vector.load %arg14[%c0_46, %c0_47] : memref<1x128xf32, #tpu.memory_space<vmem>>, vector<1x128xf32>
    %130 = vector.broadcast %129 : vector<1x128xf32> to vector<16x128xf32>
    %131 = arith.addf %128, %130 : vector<16x128xf32>
    %132 = arith.addf %87, %131 : vector<16x128xf32>
    %133 = vector.shape_cast %132 : vector<16x128xf32> to vector<1x16x128xf32>
    %c0_48 = arith.constant 0 : index
    %c0_49 = arith.constant 0 : index
    %c0_50 = arith.constant 0 : index
    %134 = vector.load %arg15[%c0_48, %c0_49, %c0_50] : memref<1x16x128xf32, #tpu.memory_space<vmem>>, vector<1x16x128xf32>
    tpu.vector_store %arg15[%c0_48, %c0_49, %c0_50], %133 {strides = array<i32>} : memref<1x16x128xf32, #tpu.memory_space<vmem>>, vector<1x16x128xf32>,
    return
  }
  func.func @transform_0(%arg0: i32) -> (i32, i32, i32) {
    %c0_i32 = arith.constant 0 : i32
    %c0_i32_0 = arith.constant 0 : i32
    %c0_i32_1 = arith.constant 0 : i32
    return %arg0, %c0_i32, %c0_i32_0 : i32, i32, i32
  }
  func.func @transform_1(%arg0: i32) -> (i32, i32) {
    %c0_i32 = arith.constant 0 : i32
    %c0_i32_0 = arith.constant 0 : i32
    %c0_i32_1 = arith.constant 0 : i32
    return %c0_i32, %c0_i32_0 : i32, i32
  }
  func.func @transform_2(%arg0: i32) -> (i32, i32) {
    %c0_i32 = arith.constant 0 : i32
    %c0_i32_0 = arith.constant 0 : i32
    %c0_i32_1 = arith.constant 0 : i32
    return %c0_i32, %c0_i32_0 : i32, i32
  }
  func.func @transform_3(%arg0: i32) -> (i32, i32) {
    %c0_i32 = arith.constant 0 : i32
    %c0_i32_0 = arith.constant 0 : i32
    %c0_i32_1 = arith.constant 0 : i32
    return %c0_i32, %c0_i32_0 : i32, i32
  }
  func.func @transform_4(%arg0: i32) -> (i32, i32) {
    %c0_i32 = arith.constant 0 : i32
    %c0_i32_0 = arith.constant 0 : i32
    %c0_i32_1 = arith.constant 0 : i32
    return %c0_i32, %c0_i32_0 : i32, i32
  }
  func.func @transform_5(%arg0: i32) -> (i32, i32) {
    %c0_i32 = arith.constant 0 : i32
    %c0_i32_0 = arith.constant 0 : i32
    %c0_i32_1 = arith.constant 0 : i32
    return %c0_i32, %c0_i32_0 : i32, i32
  }
  func.func @transform_6(%arg0: i32) -> (i32, i32) {
    %c0_i32 = arith.constant 0 : i32
    %c0_i32_0 = arith.constant 0 : i32
    %c0_i32_1 = arith.constant 0 : i32
    return %c0_i32, %c0_i32_0 : i32, i32
  }
  func.func @transform_7(%arg0: i32) -> (i32, i32) {
    %c0_i32 = arith.constant 0 : i32
    %c0_i32_0 = arith.constant 0 : i32
    %c0_i32_1 = arith.constant 0 : i32
    return %c0_i32, %c0_i32_0 : i32, i32
  }
  func.func @transform_8(%arg0: i32) -> (i32, i32) {
    %c0_i32 = arith.constant 0 : i32
    %c0_i32_0 = arith.constant 0 : i32
    %c0_i32_1 = arith.constant 0 : i32
    return %c0_i32, %c0_i32_0 : i32, i32
  }
  func.func @transform_9(%arg0: i32) -> (i32, i32) {
    %c0_i32 = arith.constant 0 : i32
    %c0_i32_0 = arith.constant 0 : i32
    %c0_i32_1 = arith.constant 0 : i32
    return %c0_i32, %c0_i32_0 : i32, i32
  }
  func.func @transform_10(%arg0: i32) -> (i32, i32) {
    %c0_i32 = arith.constant 0 : i32
    %c0_i32_0 = arith.constant 0 : i32
    %c0_i32_1 = arith.constant 0 : i32
    return %c0_i32, %c0_i32_0 : i32, i32
  }
  func.func @transform_11(%arg0: i32) -> (i32, i32) {
    %c0_i32 = arith.constant 0 : i32
    %c0_i32_0 = arith.constant 0 : i32
    %c0_i32_1 = arith.constant 0 : i32
    return %c0_i32, %c0_i32_0 : i32, i32
  }
  func.func @transform_12(%arg0: i32) -> (i32, i32) {
    %c0_i32 = arith.constant 0 : i32
    %c0_i32_0 = arith.constant 0 : i32
    %c0_i32_1 = arith.constant 0 : i32
    return %c0_i32, %c0_i32_0 : i32, i32
  }
  func.func @transform_13(%arg0: i32) -> (i32, i32) {
    %c0_i32 = arith.constant 0 : i32
    %c0_i32_0 = arith.constant 0 : i32
    %c0_i32_1 = arith.constant 0 : i32
    return %c0_i32, %c0_i32_0 : i32, i32
  }
  func.func @transform_14(%arg0: i32) -> (i32, i32, i32) {
    %c0_i32 = arith.constant 0 : i32
    %c0_i32_0 = arith.constant 0 : i32
    %c0_i32_1 = arith.constant 0 : i32
    return %arg0, %c0_i32, %c0_i32_0 : i32, i32, i32
  }
}

</mosaic_0001>

<bundles_post_ra>
// kernel: tpu_custom_call.1
= control target key start
LH: loop header
LB: loop body
LE: loop exit
PB: predicated region body
PF: predicated region fallthrough
CT: control target
= control target key end

     0   :  { %7 = vsyncpa [#allocation3], 0  ;;  %s635_s0 = inlined_call_operand.hbm [shape: f32[8,128], index: 0, kind: input, shape index: {}]   ;;  %s636_s1 = inlined_call_operand.hbm [shape: f32[16,128], index: 1, kind: input, shape index: {}]   ;;  %s637_s2 = inlined_call_operand.hbm [shape: f32[16,128], index: 2, kind: output, shape index: {}]  }
   0x1   :  { %8 = vsyncpa [#allocation6], 0 }
   0x2   :  { %10 = vsyncpa [#allocation6 + $0x1], 0 }
   0x3   :  { %11 = vsyncpa [#allocation4], 0 }
   0x4   :  { %13 = vsyncpa [#allocation4 + $0x1], 0  ;;  %s497_s9 = smov 0   ;;  %s499_s10 = smov 0  }
   0x5   :  { %s501_s11 = smov 0   ;;  %s503_s12 = smov 0  }
   0x6 LB: > { %s518_s13 = sadd.s32 4294967295, %s479_s12   ;;  %s278_s14 = sadd.s32 4294967294, %s479_s12   ;;  %s479_s12 = sphi %s503_s12, %s647_s12   ;;  %s475_s11 = sphi %s501_s11, %s646_s11   ;;  %s471_s10 = sphi %s499_s10, %s645_s10   ;;  %s467_s9 = sphi %s497_s9, %s644_s9  }
   0x7   : > { %p60_p0 = scmp.ne.s32.totalorder %s471_s10, %s467_s9  ;;  %p61_p1 = scmp.eq.s32.totalorder %s518_s13, 0 }
   0x8   : > { %p84_p2 = scmp.eq.s32.totalorder %s518_s13, 1  ;;  %p90_p3 = scmp.eq.s32.totalorder %s278_s14, 1 }
   0x9   : > { %p527_p4 = por %p61_p1, %p60_p0  ;;  %p279_p5 = scmp.ge.s32.totalorder %s479_s12, 1 }
   0xa   : > { %p532_p6 = por %p90_p3, %p60_p0  ;;  %p97_p7 = scmp.lt.s32.totalorder %s479_s12, 3 }
   0xb   : > { %s109_s19 = sshll.u32 %s635_s0, 4  ;;  %s481_s21 = smov [#allocation2]   ;;  %s110_s19 = int_to_ptr.hbm [resolvable:$true] %s109_s19 }
   0xc   : > { %p540_p8 = pnand %p279_p5, %p97_p7  ;;  %s111_s22 = sshll.u32 %s481_s21, 4  ;;  %s112_s22 = int_to_ptr.vmem [resolvable:$true] %s111_s22 }
   0xd   : > { %s550_s23 = sadd.s32 1, %s479_s12   ;;  %s47_s24 = sadd.s32 1, %s475_s11 }
   0xe   : > { %p300_p10 = pneg %p540_p8  ;;  %s44_s25 = ssub.s32 %s479_s12, %s550_s23 }
   0xf   : > { %p45_p12 = scmp.eq.s32.totalorder %s44_s25, 0  ;;  %p54_p13 = scmp.ne.s32.totalorder %s475_s11, %s471_s10 }
  0x10   : > { %p301_p11 = pnand %p300_p10, %p61_p1  ;;  %p55_p0 = scmp.eq.s32.totalorder %s479_s12, 0 }
  0x11   : > { %s559_s26 = scalar_select %p45_p12, %s475_s11, %s47_s24  }
  0x12   : > { %303 = dma.hbm_to_vmem [thread:$0]  (!%p301_p11), %s110_s19, 128, %s112_s22, [#allocation3]  }
  0x13   : > { %p563_p3 = por %p84_p2, %p54_p13  ;;  %p313_p5 = scmp.lt.s32.totalorder %s479_s12, 2 }
  0x14   : > { %s122_s28 = sand.u32 1, %s475_s11   ;;  %s283_s29 = sshll.u32 %s479_s12, 3 }
  0x15   : > { %p56_p7 = por %p55_p0, %p54_p13  ;;  %s282_s30 = sshll.u32 %s122_s28, 3 }
  0x16   : > { %s130_s5 = scalar_lea.hbm %s636_s1, %s283_s29  ;;  %s126_s7 = scalar_lea.vmem [#allocation5], %s282_s30 }
  0x17   : > { %s132_s6 = sshll.u32 %s130_s5, 4  ;;  %s134_s8 = sshll.u32 %s126_s7, 4  ;;  %s133_s6 = int_to_ptr.hbm [resolvable:$true] %s132_s6  ;;  %s135_s8 = int_to_ptr.vmem [resolvable:$true] %s134_s8 }
  0x18   : > { %p573_p10 = pnand %p313_p5, %p56_p7  ;;  %s123_s17 = scalar_lea.sflag [#allocation6], %s122_s28 }
  0x19   : > { %s379_s18 = sshra.s32 %s133_s6, 4  ;;  %s386_s24 = scalar_lea.hbm %s636_s1, 16  ;;  %s380_s18 = int_to_ptr.hbm [resolvable:$true] %s379_s18 }
  0x1a   : > { %s381_s19 = scalar_lea.hbm %s380_s18, 8  ;;  %p383_p11 = pneg %p573_p10 }
  0x1b   : > { %p382_p2 = scmp.ne.s32.totalorder %s380_s18, %s381_s19  ;;  %p387_p0 = scmp.lt.s32.totalorder %s380_s18, %s636_s1 }
  0x1c   : > { %p388_p5 = scmp.lt.s32.totalorder %s386_s24, %s381_s19 }
  0x1d   : > { %p384_p12 = pnand %p383_p11, %p382_p2 }
  0x1e   : > { %p389_p7 = por %p388_p5, %p387_p0 }
  0x1f   : > { %p385_p13 = pneg %p384_p12 }
  0x21   : > { %p390_p9 = pnand %p389_p7, %p385_p13 }
  0x23   : > { %393 = shalt.err (!%p390_p9)
}
  0x24   : > { %307 = dma.hbm_to_vmem [thread:$0]  (!%p573_p10), %s133_s6, 128, %s135_s8, %s123_s17  }
  0x25   : > { %143 = sbr.rel (%p540_p8) target bundleno = 62 (0x3e), region = 28 }
  0x2a   : > { %454 = dma.done.wait (%p61_p1), [#allocation3], 128  }
  0x2b   : > { %456 = vsyncadd (%p61_p1), [#allocation3], 4294967168  ;;  %s594_s28 = sand.u32 1, %s471_s10  }
  0x2c   : > { %s286_s30 = sshll.u32 %s594_s28, 3  ;;  %s151_s3 = scalar_lea.sflag [#allocation6], %s594_s28 }
  0x2d   : > { %s154_s4 = scalar_lea.vmem [#allocation5], %s286_s30 }
  0x2e   : > { %458 = dma.done.wait (%p527_p4), %s151_s3, 128  }
  0x2f   : > { %460 = vsyncadd (%p527_p4), %s151_s3, 4294967168  ;;  %s289_s20 = sshll.u32 %s518_s13, 3  ;;  %s175_s8 = scalar_lea.vmem [#allocation7], %s286_s30  ;;  %v176_v0 = vld [vmem:[%s154_s4] sm:$0xff]  ;;  %v177_v1 = vld [vmem:[#allocation2] sm:$0xff] }
  0x30   : > { %s191_s7 = scalar_lea.hbm %s637_s2, %s289_s20  ;;  %s193_s14 = sshll.u32 %s175_s8, 4  ;;  %v178_v2 = vadd.f32 %v177_v1, %v176_v0  ;;  %s194_s14 = int_to_ptr.vmem [resolvable:$true] %s193_s14 }
  0x31   : > { %s195_s17 = sshll.u32 %s191_s7, 4  ;;  %s181_s18 = scalar_lea.sflag [#allocation4], %s594_s28  ;;  %s196_s17 = int_to_ptr.hbm [resolvable:$true] %s195_s17 }
  0x32   : > { %179 = vst [vmem:[%s175_s8] sm:$0xff] %v178_v2  ;;  %s423_s15 = sshra.s32 %s196_s17, 4  ;;  %s429_s22 = scalar_lea.hbm %s637_s2, 16  ;;  %s424_s15 = int_to_ptr.hbm [resolvable:$true] %s423_s15 }
  0x33   : > { %s425_s19 = scalar_lea.hbm %s424_s15, 8  ;;  %p430_p9 = scmp.lt.s32.totalorder %s424_s15, %s637_s2 }
  0x34   : > { %p426_p1 = scmp.ne.s32.totalorder %s424_s15, %s425_s19  ;;  %p431_p10 = scmp.lt.s32.totalorder %s429_s22, %s425_s19 }
  0x36   : > { %p427_p4 = pnand %p426_p1, %p563_p3  ;;  %p432_p2 = por %p431_p10, %p430_p9 }
  0x38   : > { %p428_p8 = pneg %p427_p4 }
  0x3a   : > { %p433_p11 = pnand %p432_p2, %p428_p8 }
  0x3c   : > { %436 = shalt.err (!%p433_p11)
}
  0x3d   : > { %298 = dma.vmem_to_hbm [thread:$0]  (%p563_p3), %s194_s14, 128, %s196_s17, %s181_s18  }
  0x3e PF: > { %s207_s29 = sand.u32 1, %s467_s9   ;;  %p643_p12 = scmp.ge.s32.totalorder %s479_s12, 2 }
  0x3f   : > { %s208_s28 = scalar_lea.sflag [#allocation4], %s207_s29 }
  0x40   : > { %p309_p13 = pnand %p643_p12, %p532_p6 }
  0x42   : > { %p310_p0 = pneg %p309_p13 }
  0x44   : > { %462 = dma.done.wait (%p310_p0), %s208_s28, 128  }
  0x45   : > { %464 = vsyncadd (%p310_p0), %s208_s28, 4294967168  ;;  %p16_p5 = scmp.ge.s32.totalorder %s550_s23, 4   ;;  %s644_s9 = smov %s471_s10 }
  0x46   : > { %s645_s10 = smov %s475_s11  ;;  %s646_s11 = smov %s559_s26 }
  0x47   : > { %s647_s12 = smov %s550_s23  ;;  %18 = sbr.rel (!%p16_p5) target bundleno = 6 (0x6), region = 78 }
  0x4c   :  { %214 = vsyncpa [#allocation3], 1 }
  0x4d   :  { %216 = vsyncpa [#allocation3 + $0x1], 1 }
  0x4e   :  { %217 = vsyncpa [#allocation6], 1 }
  0x4f   :  { %219 = vsyncpa [#allocation6 + $0x1], 1 }
  0x50   :  { %220 = vsyncpa [#allocation4], 1 }
  0x51   :  { %222 = vsyncpa [#allocation4 + $0x1], 1 }

// kernel: tpu_custom_call.1
= control target key start
LH: loop header
LB: loop body
LE: loop exit
PB: predicated region body
PF: predicated region fallthrough
CT: control target
= control target key end

     0   :  { %s4151_s0 = inlined_call_operand.hbm [shape: f32[2,16,128], index: 0, kind: input, shape index: {}]   ;;  %s4152_s1 = inlined_call_operand.hbm [shape: f32[16,16], index: 1, kind: input, shape index: {}]   ;;  %s4153_s2 = inlined_call_operand.hbm [shape: f32[1,128], index: 2, kind: input, shape index: {}]   ;;  %s4154_s3 = inlined_call_operand.hbm [shape: f32[1,128], index: 3, kind: input, shape index: {}]   ;;  %s4155_s4 = inlined_call_operand.hbm [shape: bf16[128,384], index: 4, kind: input, shape index: {}]   ;;  %s4156_s5 = inlined_call_operand.vmem [shape: f32[1,384], index: 5, kind: input, shape index: {}]   ;;  %s4157_s6 = inlined_call_operand.hbm [shape: bf16[128,128], index: 6, kind: input, shape index: {}]   ;;  %s4158_s7 = inlined_call_operand.hbm [shape: f32[1,128], index: 7, kind: input, shape index: {}]   ;;  %s4159_s8 = inlined_call_operand.hbm [shape: f32[1,128], index: 8, kind: input, shape index: {}]   ;;  %s4160_s9 = inlined_call_operand.vmem [shape: f32[1,128], index: 9, kind: input, shape index: {}]   ;;  %s4161_s10 = inlined_call_operand.hbm [shape: bf16[128,512], index: 10, kind: input, shape index: {}]   ;;  %s4162_s11 = inlined_call_operand.vmem [shape: f32[1,512], index: 11, kind: input, shape index: {}]   ;;  %s4163_s12 = inlined_call_operand.hbm [shape: bf16[512,128], index: 12, kind: input, shape index: {}]   ;;  %s4164_s13 = inlined_call_operand.vmem [shape: f32[1,128], index: 13, kind: input, shape index: {}]   ;;  %s4165_s14 = inlined_call_operand.hbm [shape: f32[2,16,128], index: 14, kind: output, shape index: {}]  }
   0x1   :  { %4170 = sst [smem:[#allocation27_spill]] %s4152_s1 }
   0x2   :  { %4171 = sst [smem:[#allocation28_spill]] %s4153_s2 }
   0x3   :  { %4172 = sst [smem:[#allocation29_spill]] %s4154_s3 }
   0x4   :  { %4173 = sst [smem:[#allocation30_spill]] %s4155_s4 }
   0x5   :  { %4174 = sst [smem:[#allocation31_spill]] %s4157_s6 }
   0x6   :  { %4175 = sst [smem:[#allocation32_spill]] %s4159_s8 }
   0x7   :  { %4176 = sst [smem:[#allocation33_spill]] %s4164_s13 }
   0x8   :  { %4177 = sst [smem:[#allocation34_spill]] %s4165_s14 }
   0x9   :  { %19 = vsyncpa [#allocation3], 0 }
   0xa   :  { %21 = vsyncpa [#allocation3 + $0x1], 0 }
   0xb   :  { %22 = vsyncpa [#allocation6], 0 }
   0xc   :  { %23 = vsyncpa [#allocation9], 0 }
   0xd   :  { %24 = vsyncpa [#allocation12], 0 }
   0xe   :  { %25 = vsyncpa [#allocation15], 0 }
   0xf   :  { %26 = vsyncpa [#allocation18], 0 }
  0x10   :  { %27 = vsyncpa [#allocation4], 0 }
  0x11   :  { %29 = vsyncpa [#allocation4 + $0x1], 0  ;;  %s3617_s29 = smov 0   ;;  %s3619_s30 = smov 0  }
  0x12   :  { %s3621_s15 = smov 0   ;;  %s3623_s16 = smov 0  }
  0x13 LB: > { %s4178_s1 = sld [smem:[#allocation27_spill]]  ;;  %s3641_s20 = sadd.s32 4294967295, %s3517_s16   ;;  %s3517_s16 = sphi %s3623_s16, %s4213_s16   ;;  %s3513_s15 = sphi %s3621_s15, %s4212_s15   ;;  %s3509_s30 = sphi %s3619_s30, %s4211_s30   ;;  %s3505_s29 = sphi %s3617_s29, %s4210_s29  }
  0x14   : > { %p2356_p0 = scmp.ge.s32.totalorder %s3517_s16, 1  ;;  %p56_p1 = scmp.eq.s32.totalorder %s3641_s20, 0 }
  0x15   : > { %p365_p2 = scmp.lt.s32.totalorder %s3517_s16, 3  ;;  %s3519_s22 = smov [#allocation5]  }
  0x16   : > { %s378_s23 = sshll.u32 %s3519_s22, 4  ;;  %s4180_s3 = sld [smem:[#allocation29_spill]]  ;;  %s379_s23 = int_to_ptr.vmem [resolvable:$true] %s378_s23 }
  0x17   : > { %p3646_p3 = pnand %p2356_p0, %p365_p2  ;;  %s4182_s6 = sld [smem:[#allocation31_spill]] }
  0x18   : > { %s3520_s22 = smov [#allocation8]   ;;  %s4167_s14 = smov 128  }
  0x19   : > { %s376_s19 = sshll.u32 %s4178_s1, 4  ;;  %p2925_p4 = pneg %p3646_p3  ;;  %s377_s19 = int_to_ptr.hbm [resolvable:$true] %s376_s19 }
  0x1a   : > { %s405_s1 = sshll.u32 %s3520_s22, 4  ;;  %s4168_s13 = smov 8   ;;  %s406_s1 = int_to_ptr.vmem [resolvable:$true] %s405_s1 }
  0x1b   : > { %p3658_p6 = pnand %p2925_p4, %p56_p1  ;;  %s3523_s24 = smov [#allocation11]  }
  0x1c   : > { %s403_s26 = sshll.u32 %s4180_s3, 4  ;;  %s433_s25 = sshll.u32 %s3523_s24, 4  ;;  %s404_s26 = int_to_ptr.hbm [resolvable:$true] %s403_s26  ;;  %s434_s25 = int_to_ptr.vmem [resolvable:$true] %s433_s25 }
  0x1d   : > { %s431_s18 = sshll.u32 %s4182_s6, 4  ;;  %s4183_s8 = sld [smem:[#allocation32_spill]]  ;;  %s432_s18 = int_to_ptr.hbm [resolvable:$true] %s431_s18 }
  0x1e   : > { %2928 = dma.hbm_to_vmem [thread:$0]  (!%p3658_p6), %s377_s19, 256, %s379_s23, [#allocation6], %s4167_s14, %s4167_s14, %s4168_s13  }
  0x1f   : > { %2934 = dma.hbm_to_vmem [thread:$0]  (!%p3658_p6), %s404_s26, 16, %s406_s1, [#allocation9]  }
  0x20   : > { %s4169_s22 = smov 64   ;;  %s3525_s6 = smov 4  }
  0x21   : > { %2940 = dma.hbm_to_vmem [thread:$0]  (!%p3658_p6), %s432_s18, 1024, %s434_s25, [#allocation12], %s4169_s22, %s4169_s22, %s3525_s6  }
  0x22   : > { %s3526_s19 = smov [#allocation14]   ;;  %s4184_s2 = sld [smem:[#allocation28_spill]] }
  0x23   : > { %s458_s3 = sshll.u32 %s4183_s8, 4  ;;  %s460_s23 = sshll.u32 %s3526_s19, 4  ;;  %s459_s3 = int_to_ptr.hbm [resolvable:$true] %s458_s3  ;;  %s461_s23 = int_to_ptr.vmem [resolvable:$true] %s460_s23 }
  0x24   : > { %2946 = dma.hbm_to_vmem [thread:$0]  (!%p3658_p6), %s459_s3, 16, %s461_s23, [#allocation15]  }
  0x25   : > { %s4185_s4 = sld [smem:[#allocation30_spill]]  ;;  %s3527_s13 = smov [#allocation7]  }
  0x26   : > { %s393_s8 = sshll.u32 %s3527_s13, 4  ;;  %s3528_s18 = smov [#allocation10]   ;;  %s394_s8 = int_to_ptr.vmem [resolvable:$true] %s393_s8 }
  0x27   : > { %s416_s25 = sshll.u32 %s3528_s18, 4  ;;  %s3529_s14 = smov 192   ;;  %s417_s25 = int_to_ptr.vmem [resolvable:$true] %s416_s25 }
  0x28   : > { %s391_s26 = sshll.u32 %s4184_s2, 4  ;;  %s3530_s19 = smov 12   ;;  %s392_s26 = int_to_ptr.hbm [resolvable:$true] %s391_s26 }
  0x29   : > { %2931 = dma.hbm_to_vmem [thread:$0]  (!%p3658_p6), %s392_s26, 16, %s394_s8, [#allocation6]  }
  0x2a   : > { %s446_s1 = sshll.u32 %s4158_s7, 4  ;;  %s3531_s24 = smov [#allocation13]   ;;  %s447_s1 = int_to_ptr.hbm [resolvable:$true] %s446_s1 }
  0x2b   : > { %s414_s17 = sshll.u32 %s4185_s4, 4  ;;  %s448_s13 = sshll.u32 %s3531_s24, 4  ;;  %s415_s17 = int_to_ptr.hbm [resolvable:$true] %s414_s17  ;;  %s449_s13 = int_to_ptr.vmem [resolvable:$true] %s448_s13 }
  0x2c   : > { %2937 = dma.hbm_to_vmem [thread:$0]  (!%p3658_p6), %s415_s17, 3072, %s417_s25, [#allocation9], %s3529_s14, %s3529_s14, %s3530_s19  }
  0x2d   : > { %s472_s8 = sshll.u32 %s4161_s10, 4  ;;  %s3532_s26 = smov [#allocation16]   ;;  %s473_s8 = int_to_ptr.hbm [resolvable:$true] %s472_s8 }
  0x2e   : > { %2943 = dma.hbm_to_vmem [thread:$0]  (!%p3658_p6), %s447_s1, 16, %s449_s13, [#allocation12]  }
  0x2f   : > { %s474_s17 = sshll.u32 %s3532_s26, 4  ;;  %s3533_s18 = smov 256   ;;  %s475_s17 = int_to_ptr.vmem [resolvable:$true] %s474_s17 }
  0x30   : > { %s3534_s25 = smov 16   ;;  %s489_s19 = sshll.u32 %s4163_s12, 4  ;;  %s490_s19 = int_to_ptr.hbm [resolvable:$true] %s489_s19 }
  0x31   : > { %2949 = dma.hbm_to_vmem [thread:$0]  (!%p3658_p6), %s473_s8, 4096, %s475_s17, [#allocation15], %s3533_s18, %s3533_s18, %s3534_s25  }
  0x32   : > { %s3535_s3 = smov [#allocation17]   ;;  %s4186_s1 = smov 64  }
  0x33   : > { %s491_s23 = sshll.u32 %s3535_s3, 4  ;;  %s2355_s24 = sadd.s32 4294967294, %s3517_s16   ;;  %s492_s23 = int_to_ptr.vmem [resolvable:$true] %s491_s23 }
  0x34   : > { %2952 = dma.hbm_to_vmem [thread:$0]  (!%p3658_p6), %s490_s19, 4096, %s492_s23, [#allocation18], %s4186_s1, %s4186_s1, %s3525_s6  }
  0x35   : > { %s3712_s13 = sadd.s32 1, %s3517_s16   ;;  %s42_s28 = sadd.s32 1, %s3513_s15 }
  0x36   : > { %s39_s8 = ssub.s32 %s3517_s16, %s3712_s13  ;;  %p49_p7 = scmp.ne.s32.totalorder %s3513_s15, %s3509_s30 }
  0x37   : > { %p40_p8 = scmp.eq.s32.totalorder %s39_s8, 0  ;;  %p50_p9 = scmp.eq.s32.totalorder %s3517_s16, 0 }
  0x38   : > { %p55_p10 = scmp.ne.s32.totalorder %s3509_s30, %s3505_s29  ;;  %p352_p11 = scmp.eq.s32.totalorder %s3641_s20, 1 }
  0x39   : > { %s3724_s26 = scalar_select %p40_p8, %s3513_s15, %s42_s28  }
  0x3a   : > { %p3728_p12 = por %p56_p1, %p55_p10  ;;  %p3732_p13 = por %p352_p11, %p49_p7 }
  0x3b   : > { %p358_p0 = scmp.eq.s32.totalorder %s2355_s24, 1  ;;  %p51_p2 = por %p50_p9, %p49_p7 }
  0x3c   : > { %s508_s17 = sand.u32 1, %s3513_s15   ;;  %p2970_p6 = scmp.lt.s32.totalorder %s3517_s16, 2 }
  0x3d   : > { %p3737_p4 = por %p358_p0, %p55_p10  ;;  %s2367_s25 = sshll.u32 %s508_s17, 4 }
  0x3e   : > { %s2787_s22 = sshll.u32 %s3517_s16, 4  ;;  %s512_s1 = scalar_lea.vmem [#allocation2], %s2367_s25 }
  0x3f   : > { %s517_s3 = scalar_lea.hbm %s4151_s0, %s2787_s22  ;;  %s520_s28 = sshll.u32 %s512_s1, 4  ;;  %s521_s28 = int_to_ptr.vmem [resolvable:$true] %s520_s28 }
  0x40   : > { %s518_s23 = sshll.u32 %s517_s3, 4  ;;  %p3746_p8 = pnand %p2970_p6, %p51_p2  ;;  %s519_s23 = int_to_ptr.hbm [resolvable:$true] %s518_s23 }
  0x41   : > { %s509_s8 = scalar_lea.sflag [#allocation3], %s508_s17  ;;  %s3401_s2 = sshra.s32 %s519_s23, 4  ;;  %s3402_s2 = int_to_ptr.hbm [resolvable:$true] %s3401_s2 }
  0x42   : > { %s3403_s4 = scalar_lea.hbm %s3402_s2, 16  ;;  %p3405_p9 = pneg %p3746_p8 }
  0x43   : > { %p3404_p7 = scmp.ne.s32.totalorder %s3402_s2, %s3403_s4  ;;  %s3408_s25 = scalar_lea.hbm %s4151_s0, 32 }
  0x44   : > { %p3409_p0 = scmp.lt.s32.totalorder %s3402_s2, %s4151_s0  ;;  %p3410_p2 = scmp.lt.s32.totalorder %s3408_s25, %s3403_s4 }
  0x45   : > { %p3406_p10 = pnand %p3405_p9, %p3404_p7 }
  0x46   : > { %p3411_p6 = por %p3410_p2, %p3409_p0 }
  0x47   : > { %p3407_p11 = pneg %p3406_p10 }
  0x49   : > { %p3412_p5 = pnand %p3411_p6, %p3407_p11 }
  0x4b   : > { %3415 = shalt.err (!%p3412_p5)
}
  0x4c   : > { %s4191_s17 = smov 8   ;;  %s4192_s1 = smov 128  }
  0x4d   : > { %2956 = dma.hbm_to_vmem [thread:$0]  (!%p3746_p8), %s519_s23, 256, %s521_s28, %s509_s8, %s4192_s1, %s4192_s1, %s4191_s17  }
  0x4e   : > { %532 = sbr.rel (%p3646_p3) target bundleno = 2095 (0x82f), region = 76  ;;  %s3766_s22 = sand.u32 (!%p3646_p3), 1, %s3509_s30  }
  0x4f   : > { %s2371_s2 = sshll.u32 (!%p3646_p3), %s3766_s22, 4  ;;  %s535_s4 = scalar_lea.sflag (!%p3646_p3), [#allocation3], %s3766_s22 }
  0x50   : > { %s538_s14 = scalar_lea.vmem (!%p3646_p3), [#allocation2], %s2371_s2 }
  0x53   : > { %3476 = dma.done.wait (%p3728_p12), %s535_s4, 256  }
  0x54   : > { %3478 = vsyncadd (%p3728_p12), %s535_s4, 4294967040 }
  0x55   : > { %3480 = dma.done.wait (%p56_p1), [#allocation6], 272  }
  0x56   : > { %3482 = vsyncadd (%p56_p1), [#allocation6], 4294967024 }
  0x57   : > { %3484 = dma.done.wait (%p56_p1), [#allocation9], 3088  }
  0x58   : > { %3486 = vsyncadd (%p56_p1), [#allocation9], 4294964208 }
  0x59   : > { %3488 = dma.done.wait (%p56_p1), [#allocation12], 1040  }
  0x5a   : > { %3490 = vsyncadd (%p56_p1), [#allocation12], 4294966256 }
  0x5b   : > { %3492 = dma.done.wait (%p56_p1), [#allocation15], 4112  }
  0x5c   : > { %3494 = vsyncadd (%p56_p1), [#allocation15], 4294963184 }
  0x5d   : > { %3496 = dma.done.wait (%p56_p1), [#allocation18], 4096  }
  0x5e   : > { %3498 = vsyncadd (%p56_p1), [#allocation18], 4294963200  ;;  %v3796_v0 = vld [vmem:[%s538_s14] sm:$0xff]  ;;  %v3799_v1 = vld [vmem:[%s538_s14 + $0x8] sm:$0xff]  ;;  %v3536_v2 = vmov 128.0   ;;  %s3537_s23 = smov 96  }
  0x5f   : > { %634 = vadd.xlane.f32.xlu0 %v3796_v0  ;;  %3057 = vrcp.f32 %v3536_v2  ;;  %v2468_v17 = vld [vmem:[#allocation10 + $0xa8] sm:$0xf]  ;;  %v2810_v18 = vld [vmem:[#allocation10 + $0xb0] sm:$0xf0]  ;;  %v2809_v19 = vld [vmem:[#allocation10 + $0xac] sm:$0xf] }
  0x60   : > { %v2469_v20 = vor.u32 %v2810_v18, %v2468_v17  ;;  %v2470_v21 = vld [vmem:[#allocation10 + $0xb4] sm:$0xf0]  ;;  %v2476_v22 = vld [vmem:[#allocation10 + $0xb0] sm:$0xf]  ;;  %v2811_v23 = vld [vmem:[#allocation10 + $0xb8] sm:$0xf0] }
  0x61   : > { %v2473_v24 = vor.u32 %v2809_v19, %v2470_v21  ;;  %v2477_v25 = vor.u32 %v2811_v23, %v2476_v22  ;;  %v2456_v26 = vld [vmem:[#allocation10 + $0x90] sm:$0xf]  ;;  %v2807_v27 = vld [vmem:[#allocation10 + $0x98] sm:$0xf0]  ;;  %v2806_v28 = vld [vmem:[#allocation10 + $0x94] sm:$0xf] }
  0x62   : > { %860 = vmatpush.bf16.msra.mxu0 %v2469_v20  ;;  %v2457_v29 = vor.u32 %v2807_v27, %v2456_v26  ;;  %v2458_v30 = vld [vmem:[#allocation10 + $0x9c] sm:$0xf0]  ;;  %v2464_v31 = vld [vmem:[#allocation10 + $0x98] sm:$0xf]  ;;  %v2808_v32 = vld [vmem:[#allocation10 + $0xa0] sm:$0xf0] }
  0x63   : > { %874 = vmatpush.bf16.msra.mxu1 %v2473_v24  ;;  %888 = vmatpush.bf16.msra.mxu2 %v2477_v25  ;;  %v2461_v33 = vor.u32 %v2806_v28, %v2458_v30  ;;  %v2465_v34 = vor.u32 %v2808_v32, %v2464_v31  ;;  %v2444_v35 = vld [vmem:[#allocation10 + $0x78] sm:$0xf]  ;;  %v2804_v36 = vld [vmem:[#allocation10 + $0x80] sm:$0xf0]  ;;  %v2803_v37 = vld [vmem:[#allocation10 + $0x7c] sm:$0xf] }
  0x64   : > { %v2445_v38 = vor.u32 %v2804_v36, %v2444_v35  ;;  %v2446_v39 = vld [vmem:[#allocation10 + $0x84] sm:$0xf0]  ;;  %v2452_v40 = vld [vmem:[#allocation10 + $0x80] sm:$0xf]  ;;  %v2805_v41 = vld [vmem:[#allocation10 + $0x88] sm:$0xf0] }
  0x65   : > { %v3058_v3 = vpop.eup %3057  ;;  %v2449_v42 = vor.u32 %v2803_v37, %v2446_v39  ;;  %v2453_v43 = vor.u32 %v2805_v41, %v2452_v40  ;;  %v2432_v44 = vld [vmem:[#allocation10 + $0x60] sm:$0xf]  ;;  %v2801_v45 = vld [vmem:[#allocation10 + $0x68] sm:$0xf0]  ;;  %v2800_v46 = vld [vmem:[#allocation10 + $0x64] sm:$0xf] }
  0x66   : > { %v639_v4 = vmul.f32 128.0, %v3058_v3  ;;  %vm643_vm0 = vweird.f32 %v3058_v3  ;;  %861 = vmatpush.bf16.msra.mxu0 %v2457_v29  ;;  %v2433_v47 = vor.u32 %v2801_v45, %v2432_v44  ;;  %v2434_v48 = vld [vmem:[#allocation10 + $0x6c] sm:$0xf0]  ;;  %v2440_v49 = vld [vmem:[#allocation10 + $0x68] sm:$0xf]  ;;  %vm960_vm7 = vcmask 261120  }
  0x67   : > { %636 = vadd.xlane.f32.xlu0 %v3799_v1  ;;  %875 = vmatpush.bf16.msra.mxu1 %v2461_v33  ;;  %v2802_v50 = vld [vmem:[#allocation10 + $0x70] sm:$0xf0]  ;;  %v2437_v51 = vor.u32 %v2800_v46, %v2434_v48  ;;  %v2420_v53 = vld [vmem:[#allocation10 + $0x48] sm:$0xf]  ;;  %v2797_v55 = vld [vmem:[#allocation10 + $0x4c] sm:$0xf] }
  0x68   : > { %v640_v5 = vsub.f32 1.0, %v639_v4  ;;  %889 = vmatpush.bf16.msra.mxu2 %v2465_v34  ;;  %v2441_v52 = vor.u32 %v2802_v50, %v2440_v49  ;;  %v2798_v54 = vld [vmem:[#allocation10 + $0x50] sm:$0xf0]  ;;  %v2422_v57 = vld [vmem:[#allocation10 + $0x54] sm:$0xf0]  ;;  %s3538_s28 = smov 64  }
  0x69   : > { %v2421_v56 = vor.u32 %v2798_v54, %v2420_v53  ;;  %v2428_v58 = vld [vmem:[#allocation10 + $0x50] sm:$0xf]  ;;  %v2799_v59 = vld [vmem:[#allocation10 + $0x58] sm:$0xf0]  ;;  %v2425_v60 = vor.u32 %v2797_v55, %v2422_v57  ;;  %v2794_v2 = vld [vmem:[#allocation10 + $0x34] sm:$0xf] }
  0x6a   : > { %v641_v6 = vmul.f32 %v3058_v3, %v640_v5  ;;  %862 = vmatpush.bf16.msra.mxu0 %v2445_v38  ;;  %v2429_v61 = vor.u32 %v2799_v59, %v2428_v58  ;;  %v2408_v62 = vld [vmem:[#allocation10 + $0x30] sm:$0xf]  ;;  %v2795_v63 = vld [vmem:[#allocation10 + $0x38] sm:$0xf0]  ;;  %v2410_v4 = vld [vmem:[#allocation10 + $0x3c] sm:$0xf0] }
  0x6b   : > { %876 = vmatpush.bf16.msra.mxu1 %v2449_v42  ;;  %v2416_v5 = vld [vmem:[#allocation10 + $0x38] sm:$0xf]  ;;  %v2404_v17 = vld [vmem:[#allocation10 + $0x20] sm:$0xf]  ;;  %v2793_v18 = vld [vmem:[#allocation10 + $0x28] sm:$0xf0] }
  0x6c   : > { %v642_v7 = vadd.f32 %v3058_v3, %v641_v6  ;;  %890 = vmatpush.bf16.msra.mxu2 %v2453_v43  ;;  %v2796_v6 = vld [vmem:[#allocation10 + $0x40] sm:$0xf0]  ;;  %v2405_v20 = vor.u32 %v2793_v18, %v2404_v17  ;;  %v2384_v21 = vld [vmem:[#allocation10] sm:$0xf]  ;;  %v2789_v22 = vld [vmem:[#allocation10 + $0x8] sm:$0xf0] }
  0x6d   : > { %v2788_v23 = vld [vmem:[#allocation10 + $0x4] sm:$0xf]  ;;  %v2385_v25 = vor.u32 %v2789_v22, %v2384_v21  ;;  %v2386_v26 = vld [vmem:[#allocation10 + $0xc] sm:$0xf0]  ;;  %v2392_v27 = vld [vmem:[#allocation10 + $0x8] sm:$0xf] }
  0x6e   : > { %v3802_v8 = vsel %vm643_vm0, %v3058_v3, %v642_v7  ;;  %863 = vmatpush.bf16.msra.mxu0 %v2433_v47  ;;  %v2409_v3 = vor.u32 %v2795_v63, %v2408_v62  ;;  %v2413_v7 = vor.u32 %v2794_v2, %v2410_v4  ;;  %v2790_v28 = vld [vmem:[#allocation10 + $0x10] sm:$0xf0]  ;;  %v2389_v30 = vor.u32 %v2788_v23, %v2386_v26  ;;  %v3051_v49 = vld [vmem:[#allocation7] ss:$0 sm:$0xff]  ;;  %v3052_v54 = vld [vmem:[#allocation8] ss:$0 sm:$0xff] }
  0x6f   : > { %877 = vmatpush.bf16.msra.mxu1 %v2437_v51  ;;  %v2393_v31 = vor.u32 %v2790_v28, %v2392_v27  ;;  %s3539_s24 = smov 32   ;;  %vm1059_vm8 = vcmask 130048   ;;  %vm1286_vm9 = vcmask 523264   ;;  %vm1289_vm10 = vcmask 785408   ;;  %s4207_s4 = sld [smem:[#allocation33_spill]] }
  0x70   : > { %891 = vmatpush.bf16.msra.mxu2 %v2441_v52  ;;  %s2884_s14 = sshll.u32 %s3641_s20, 4  ;;  %s628_s21 = scalar_lea.vmem [#allocation19], %s2371_s2 }
  0x71   : > { %s2193_s8 = sshll.u32 %s628_s21, 4  ;;  %s2181_s20 = scalar_lea.sflag [#allocation4], %s3766_s22  ;;  %s2194_s8 = int_to_ptr.vmem [resolvable:$true] %s2193_s8 }
  0x72   : > { %864 = vmatpush.bf16.msra.mxu0 %v2421_v56 }
  0x73   : > { %878 = vmatpush.bf16.msra.mxu1 %v2425_v60 }
  0x74   : > { %892 = vmatpush.bf16.msra.mxu2 %v2429_v61 }
  0x76   : > { %865 = vmatpush.bf16.msra.mxu0 %v2409_v3 }
  0x77   : > { %879 = vmatpush.bf16.msra.mxu1 %v2413_v7 }
  0xd2   : > { %v635_v9 = vpop.xlane.xlu0 %634 }
  0xd3   : > { %v645_v10 = vmul.f32 %v3802_v8, %v635_v9  ;;  %v2417_v9 = vor.u32 %v2796_v6, %v2416_v5 }
  0xd5   : > { %v3806_v11 = vsub.f32 %v3796_v0, %v645_v10  ;;  %893 = vmatpush.bf16.msra.mxu2 %v2417_v9  ;;  %v2396_v10 = vld [vmem:[#allocation10 + $0x18] sm:$0xf] }
  0xd7   : > { %v649_v12 = vmul.f32 %v3806_v11, %v3806_v11 }
  0xd9   : > { %651 = vadd.xlane.f32.xlu1 %v649_v12  ;;  %v2792_v12 = vld [vmem:[#allocation10 + $0x20] sm:$0xf0]  ;;  %894 = vmatpush.bf16.msra.mxu2 %v2405_v20 }
  0xda   : > { %v637_v13 = vpop.xlane.xlu0 %636 }
  0xdb   : > { %v646_v14 = vmul.f32 %v3802_v8, %v637_v13  ;;  %v2791_v13 = vld [vmem:[#allocation10 + $0x1c] sm:$0xf] }
  0xdd   : > { %v3812_v15 = vsub.f32 %v3799_v1, %v646_v14  ;;  %v2397_v14 = vor.u32 %v2792_v12, %v2396_v10  ;;  %895 = vmatpush.bf16.msra.mxu2 %v2393_v31 }
  0xdf   : > { %v650_v16 = vmul.f32 %v3812_v15, %v3812_v15  ;;  %866 = vmatpush.bf16.msra.mxu0 %v2397_v14 }
  0xe1   : > { %653 = vadd.xlane.f32.xlu1 %v650_v16  ;;  %v2398_v16 = vld [vmem:[#allocation10 + $0x24] sm:$0xf0] }
  0xe2   : > { %v2401_v19 = vor.u32 %v2791_v13, %v2398_v16 }
  0xe3   : > { %867 = vmatpush.bf16.msra.mxu0 %v2385_v25 }
  0xe4   : > { %880 = vmatpush.bf16.msra.mxu1 %v2401_v19 }
  0xe8   : > { %881 = vmatpush.bf16.msra.mxu1 %v2389_v30 }
 0x14c   : > { %v652_v24 = vpop.xlane.xlu1 %651 }
 0x14d   : > { %v655_v29 = vmul.f32 %v652_v24, %v3802_v8 }
 0x14f   : > { %v657_v32 = vadd.f32 1e-05, %v655_v29 }
 0x151   : > { %3059 = vrsqrt.f32 %v657_v32  ;;  %vm665_vm2 = vweird.f32 %v657_v32 }
 0x154   : > { %v654_v33 = vpop.xlane.xlu1 %653 }
 0x155   : > { %v656_v34 = vmul.f32 %v654_v33, %v3802_v8 }
 0x157   : > { %v3060_v35 = vpop.eup %3059  ;;  %v658_v36 = vadd.f32 1e-05, %v656_v34 }
 0x158   : > { %v660_v37 = vmul.f32 %v3060_v35, %v657_v32  ;;  %vm666_vm1 = vweird.f32 %v3060_v35 }
 0x159   : > { %3061 = vrsqrt.f32 %v658_v36  ;;  %vm667_vm3 = vmor %vm665_vm2, %vm666_vm1  ;;  %vm675_vm5 = vweird.f32 %v658_v36 }
 0x15a   : > { %v661_v38 = vmul.f32 %v3060_v35, %v660_v37 }
 0x15c   : > { %v662_v39 = vmul.f32 0.5, %v661_v38 }
 0x15e   : > { %v663_v40 = vsub.f32 1.5, %v662_v39 }
 0x15f   : > { %v3062_v41 = vpop.eup %3061 }
 0x160   : > { %v664_v42 = vmul.f32 %v3060_v35, %v663_v40  ;;  %v670_v43 = vmul.f32 %v3062_v41, %v658_v36  ;;  %vm676_vm4 = vweird.f32 %v3062_v41 }
 0x161   : > { %vm677_vm6 = vmor %vm675_vm5, %vm676_vm4 }
 0x162   : > { %v671_v44 = vmul.f32 %v3062_v41, %v670_v43  ;;  %v668_v45 = vsel %vm667_vm3, %v3060_v35, %v664_v42 }
 0x163   : > { %v679_v48 = vmul.f32 %v668_v45, %v3806_v11  ;;  %v724_v11 = vld [vmem:[%s4156_s5] sm:$0x7] }
 0x164   : > { %v672_v46 = vmul.f32 0.5, %v671_v44  ;;  %v726_v59 = vperm.slane %v724_v11, 0  ;;  %v727_v60 = vperm.slane %v724_v11, 1  ;;  %v728_v6 = vperm.slane %v724_v11, 2 }
 0x165   : > { %v684_v53 = vmul.f32 %v3051_v49, %v679_v48 }
 0x166   : > { %v673_v47 = vsub.f32 1.5, %v672_v46 }
 0x167   : > { %v689_v56 = vadd.f32 %v3052_v54, %v684_v53 }
 0x168   : > { %v674_v50 = vmul.f32 %v3062_v41, %v673_v47 }
 0x16a   : > { %v678_v51 = vsel %vm677_vm6, %v3062_v41, %v674_v50 }
 0x16b   : > { %v680_v52 = vmul.f32 %v678_v51, %v3812_v15 }
 0x16d   : > { %v685_v55 = vmul.f32 %v3051_v49, %v680_v52 }
 0x16f   : > { %v690_v57 = vadd.f32 %v3052_v54, %v685_v55 }
 0x171   : > { %v691_v58 = vpack.c.bf16 %v690_v57, %v689_v56 }
 0x173   : > { %868 = vmatmul.bf16.vlgmr.msra.gmra.mxu0 %v691_v58  ;;  %882 = vmatmul.bf16.vlgmr.msra.gmra.mxu1 %v691_v58 }
 0x174   : > { %896 = vmatmul.bf16.vlgmr.msra.gmra.mxu2 %v691_v58 }
 0x1f0   : > { %v869_v61 = vpop.f32.mrf.mxu0  ;;  %v883_v62 = vpop.f32.mrf.mxu1 }
 0x1f1   : > { %v870_v63 = vadd.f32 %v869_v61, %v726_v59  ;;  %v884_v2 = vadd.f32 %v883_v62, %v727_v60 }
 0x1f3   : > { %v902_v15 = vmul.f32 0.17677669, %v870_v63  ;;  %v906_v3 = vpack.c.bf16 %v884_v2, %v884_v2  ;;  %v952_v2 = vld [vmem:[#allocation5] sm:$0xff] }
 0x1f5   : > { %v904_v4 = vpack.c.bf16 %v902_v15, %v902_v15  ;;  %926 = vrot.lane.b32.xlu2 %v906_v3, %s3537_s23  ;;  %v957_v18 = vunpack.c.l.b16 %v906_v3 }
 0x1f7   : > { %v897_v5 = vpop.f32.mrf.mxu2  ;;  %912 = vrot.lane.b32.xlu0 %v904_v4, %s3537_s23  ;;  %v954_v29 = vunpack.c.l.b16 %v904_v4 }
 0x1f8   : > { %v871_v7 = vpop.f32.mrf.mxu0  ;;  %v885_v9 = vpop.f32.mrf.mxu1  ;;  %v898_v16 = vadd.f32 %v897_v5, %v728_v6  ;;  %v953_v5 = vld [vmem:[#allocation5 + $0x8] sm:$0xff] }
 0x1f9   : > { %v872_v10 = vadd.f32 %v871_v7, %v726_v59  ;;  %v886_v12 = vadd.f32 %v885_v9, %v727_v60 }
 0x1fa   : > { %v3828_v22 = vpack.c.bf16 %v898_v16, %v898_v16 }
 0x1fb   : > { %v903_v13 = vmul.f32 0.17677669, %v872_v10  ;;  %v907_v14 = vpack.c.bf16 %v886_v12, %v886_v12 }
 0x1fc   : > { %v1161_v27 = vunpack.c.l.b16 %v3828_v22 }
 0x1fd   : > { %v905_v17 = vpack.c.bf16 %v903_v13, %v903_v13  ;;  %928 = vrot.lane.b32.xlu2 %v907_v14, %s3537_s23  ;;  %v958_v19 = vunpack.c.l.b16 %v907_v14 }
 0x1ff   : > { %v899_v20 = vpop.f32.mrf.mxu2  ;;  %914 = vrot.lane.b32.xlu1 %v905_v17, %s3537_s23  ;;  %918 = vrot.lane.b32.xlu0 %v905_v17, %s3538_s28  ;;  %v959_v21 = vpack.c.b16 %v958_v19, %v957_v18  ;;  %v955_v26 = vunpack.c.l.b16 %v905_v17 }
 0x200   : > { %v900_v23 = vadd.f32 %v899_v20, %v728_v6 }
 0x201   : > { %v965_v24 = vsel %vm960_vm7, %v959_v21, 0  ;;  %v956_v31 = vpack.c.b16 %v955_v26, %v954_v29 }
 0x202   : > { %v3831_v25 = vpack.c.bf16 %v900_v23, %v900_v23  ;;  %974 = vmatpush.bf16.xpose.msra.mxu3 %v965_v24 }
 0x204   : > { %v1162_v28 = vunpack.c.l.b16 %v3831_v25 }
 0x205   : > { %930 = vrot.lane.b32.xlu2 %v906_v3, %s3538_s28 }
 0x206   : > { %v1163_v30 = vpack.c.b16 %v1162_v28, %v1161_v27 }
 0x207   : > { %936 = vrot.lane.b32.xlu1 %v907_v14, %s3539_s24  ;;  %920 = vrot.lane.b32.xlu0 %v904_v4, %s3539_s24 }
 0x208   : > { %1175 = vmatpush.bf16.msrb.mxu2 %v1163_v30 }
 0x209   : > { %2478 = vmatmul.msk.bf16.vlgmr.msra.gmra.mxu3 %vm960_vm7, %v956_v31 }
 0x20d   : > { %932 = vrot.lane.b32.xlu2 %v907_v14, %s3538_s28 }
 0x20f   : > { %940 = vrot.lane.b32.xlu0 %v3828_v22, %s3537_s23 }
 0x215   : > { %916 = vrot.lane.b32.xlu2 %v904_v4, %s3538_s28 }
 0x21d   : > { %934 = vrot.lane.b32.xlu2 %v906_v3, %s3539_s24 }
 0x225   : > { %922 = vrot.lane.b32.xlu2 %v905_v17, %s3539_s24 }
 0x24f   : > { %v927_v32 = vpop.permute.xlu2 %926 }
 0x250   : > { %v984_v34 = vunpack.c.l.b16 %v927_v32 }
 0x257   : > { %v929_v33 = vpop.permute.xlu2 %928 }
 0x258   : > { %v985_v35 = vunpack.c.l.b16 %v929_v33 }
 0x25a   : > { %v986_v36 = vpack.c.b16 %v985_v35, %v984_v34 }
 0x25c   : > { %v991_v37 = vsel %vm960_vm7, %v986_v36, 0 }
 0x25d   : > { %1000 = vmatpush.bf16.xpose.msrb.mxu3 %v991_v37 }
 0x25f   : > { %v931_v38 = vpop.permute.xlu2 %930 }
 0x260   : > { %v1010_v40 = vunpack.c.l.b16 %v931_v38 }
 0x267   : > { %v933_v39 = vpop.permute.xlu2 %932 }
 0x268   : > { %v1011_v41 = vunpack.c.l.b16 %v933_v39 }
 0x269   : > { %v913_v43 = vpop.permute.xlu0 %912 }
 0x26a   : > { %v1012_v42 = vpack.c.b16 %v1011_v41, %v1010_v40  ;;  %v981_v47 = vunpack.c.l.b16 %v913_v43 }
 0x26c   : > { %v1017_v44 = vsel %vm960_vm7, %v1012_v42, 0 }
 0x26d   : > { %1026 = vmatpush.bf16.xpose.msra.mxu3 %v1017_v44 }
 0x26f   : > { %v917_v45 = vpop.permute.xlu2 %916 }
 0x270   : > { %v1007_v60 = vunpack.c.l.b16 %v917_v45 }
 0x271   : > { %v915_v46 = vpop.permute.xlu1 %914  ;;  %v919_v50 = vpop.permute.xlu0 %918 }
 0x272   : > { %v982_v48 = vunpack.c.l.b16 %v915_v46  ;;  %v1008_v11 = vunpack.c.l.b16 %v919_v50 }
 0x274   : > { %v983_v49 = vpack.c.b16 %v982_v48, %v981_v47  ;;  %v1009_v62 = vpack.c.b16 %v1008_v11, %v1007_v60 }
 0x276   : > { %2479 = vmatmul.msk.bf16.vlgmr.msrb.gmra.mxu3 %vm960_vm7, %v983_v49 }
 0x277   : > { %v935_v51 = vpop.permute.xlu2 %934 }
 0x278   : > { %v1036_v53 = vunpack.c.l.b16 %v935_v51 }
 0x279   : > { %v937_v52 = vpop.permute.xlu1 %936  ;;  %v921_v57 = vpop.permute.xlu0 %920 }
 0x27a   : > { %v1037_v54 = vunpack.c.l.b16 %v937_v52  ;;  %v1033_v61 = vunpack.c.l.b16 %v921_v57 }
 0x27c   : > { %v1038_v55 = vpack.c.b16 %v1037_v54, %v1036_v53 }
 0x27e   : > { %v1043_v56 = vsel %vm960_vm7, %v1038_v55, 0 }
 0x27f   : > { %1052 = vmatpush.bf16.xpose.msrb.mxu0 %v1043_v56  ;;  %v923_v58 = vpop.permute.xlu2 %922 }
 0x280   : > { %v1034_v59 = vunpack.c.l.b16 %v923_v58 }
 0x281   : > { %v3854_v16 = vpop.permute.xlu0 %940 }
 0x282   : > { %v1035_v63 = vpack.c.b16 %v1034_v59, %v1033_v61 }
 0x286   : > { %2480 = vmatmul.msk.bf16.vlgmr.msra.gmra.mxu3 %vm960_vm7, %v1009_v62  ;;  %2481 = vmatmul.msk.bf16.vlgmr.msrb.gmra.mxu0 %vm960_vm7, %v1035_v63 }
 0x28c   : > { %v976_v15 = vpop.f32.mrf.mxu3 }
 0x28d   : > { %v977_v3 = vadd.f32 %v976_v15, %v952_v2 }
 0x28f   : > { %v1060_v4 = vsel %vm1059_vm8, %v977_v3, -inf }
 0x290   : > { %1061 = vmax.xlane.f32.xlu1 %v1060_v4 }
 0x294   : > { %v978_v6 = vpop.f32.mrf.mxu3 }
 0x295   : > { %v979_v7 = vadd.f32 %v978_v6, %v953_v5 }
 0x297   : > { %v1063_v9 = vsel %vm1059_vm8, %v979_v7, -inf }
 0x298   : > { %1064 = vmax.xlane.f32.xlu0 %v1063_v9 }
 0x2f9   : > { %v1002_v10 = vpop.f32.mrf.mxu3 }
 0x2fa   : > { %v1003_v12 = vadd.f32 %v1002_v10, %v952_v2 }
 0x2fc   : > { %v1066_v13 = vsel %vm1059_vm8, %v1003_v12, -inf }
 0x2fd   : > { %1067 = vmax.xlane.f32.xlu2 %v1066_v13  ;;  %v1187_v13 = vunpack.c.l.b16 %v3854_v16 }
 0x301   : > { %v1004_v14 = vpop.f32.mrf.mxu3 }
 0x302   : > { %v1005_v26 = vadd.f32 %v1004_v14, %v953_v5 }
 0x303   : > { %v1054_v17 = vpop.f32.mrf.mxu0  ;;  %v1062_v18 = vpop.xlane.xlu1 %1061 }
 0x304   : > { %v1055_v19 = vadd.f32 %v1054_v17, %v952_v2  ;;  %v1084_v20 = vsub.f32 %v977_v3, %v1062_v18  ;;  %v1069_v34 = vsel %vm1059_vm8, %v1005_v26, -inf }
 0x306   : > { %v1092_v21 = vmul.f32 1.442695, %v1084_v20  ;;  %v1078_v23 = vsel %vm1059_vm8, %v1055_v19, -inf }
 0x307   : > { %1079 = vmax.xlane.f32.xlu1 %v1078_v23 }
 0x308   : > { %3063 = vpow2.f32 %v1092_v21 }
 0x309   : > { %v1028_v24 = vpop.f32.mrf.mxu3 }
 0x30a   : > { %v1029_v37 = vadd.f32 %v1028_v24, %v952_v2 }
 0x30b   : > { %v1056_v27 = vpop.f32.mrf.mxu0  ;;  %v1065_v28 = vpop.xlane.xlu0 %1064 }
 0x30c   : > { %v1057_v29 = vadd.f32 %v1056_v27, %v953_v5  ;;  %v1085_v30 = vsub.f32 %v979_v7, %v1065_v28  ;;  %v1072_v40 = vsel %vm1059_vm8, %v1029_v37, -inf }
 0x30e   : > { %v3064_v31 = vpop.eup %3063  ;;  %v1094_v32 = vmul.f32 1.442695, %v1085_v30  ;;  %v1081_v33 = vsel %vm1059_vm8, %v1057_v29, -inf }
 0x30f   : > { %1082 = vmax.xlane.f32.xlu0 %v1081_v33  ;;  %1070 = vmax.xlane.f32.xlu1 %v1069_v34  ;;  %v1108_v35 = vsel %vm1059_vm8, %v3064_v31, 0.0 }
 0x310   : > { %3065 = vpow2.f32 %v1094_v32  ;;  %1109 = vadd.xlane.f32.xlu2 %v1108_v35 }
 0x311   : > { %v1030_v36 = vpop.f32.mrf.mxu3 }
 0x312   : > { %v3860_v38 = vadd.f32 %v1030_v36, %v953_v5 }
 0x314   : > { %v1075_v42 = vsel %vm1059_vm8, %v3860_v38, -inf }
 0x316   : > { %v3066_v39 = vpop.eup %3065 }
 0x317   : > { %1073 = vmax.xlane.f32.xlu0 %v1072_v40  ;;  %v1111_v41 = vsel %vm1059_vm8, %v3066_v39, 0.0 }
 0x318   : > { %1112 = vadd.xlane.f32.xlu1 %v1111_v41  ;;  %1076 = vmax.xlane.f32.xlu2 %v1075_v42 }
 0x330   : > { %942 = vrot.lane.b32.xlu2 %v3831_v25, %s3537_s23 }
 0x370   : > { %v1068_v43 = vpop.xlane.xlu2 %1067 }
 0x371   : > { %v1086_v44 = vsub.f32 %v1003_v12, %v1068_v43 }
 0x373   : > { %v1096_v45 = vmul.f32 1.442695, %v1086_v44 }
 0x375   : > { %3067 = vpow2.f32 %v1096_v45 }
 0x37a   : > { %v1080_v46 = vpop.xlane.xlu1 %1079 }
 0x37b   : > { %v3868_v47 = vpop.eup %3067  ;;  %v1090_v48 = vsub.f32 %v1055_v19, %v1080_v46 }
 0x37c   : > { %v1114_v49 = vsel %vm1059_vm8, %v3868_v47, 0.0 }
 0x37d   : > { %v1104_v50 = vmul.f32 1.442695, %v1090_v48  ;;  %1115 = vadd.xlane.f32.xlu0 %v1114_v49 }
 0x37f   : > { %3069 = vpow2.f32 %v1104_v50 }
 0x382   : > { %v1083_v51 = vpop.xlane.xlu0 %1082  ;;  %v1071_v52 = vpop.xlane.xlu1 %1070 }
 0x383   : > { %v1091_v53 = vsub.f32 %v1057_v29, %v1083_v51  ;;  %v1087_v54 = vsub.f32 %v1005_v26, %v1071_v52  ;;  %v1110_v55 = vpop.xlane.xlu2 %1109 }
 0x384   : > { %3071 = vrcp.f32 %v1110_v55 }
 0x385   : > { %v3872_v56 = vpop.eup %3069  ;;  %v1106_v57 = vmul.f32 1.442695, %v1091_v53  ;;  %v1098_v58 = vmul.f32 1.442695, %v1087_v54 }
 0x386   : > { %v1126_v11 = vsel %vm1059_vm8, %v3872_v56, 0.0 }
 0x387   : > { %3073 = vpow2.f32 %v1106_v57  ;;  %1127 = vadd.xlane.f32.xlu2 %v1126_v11 }
 0x388   : > { %3075 = vpow2.f32 %v1098_v58 }
 0x38a   : > { %v1074_v59 = vpop.xlane.xlu0 %1073  ;;  %v3072_v63 = vpop.eup %3071 }
 0x38b   : > { %v1088_v60 = vsub.f32 %v1029_v37, %v1074_v59  ;;  %v1077_v61 = vpop.xlane.xlu2 %1076  ;;  %v1113_v62 = vpop.xlane.xlu1 %1112  ;;  %v1140_v5 = vmul.f32 %v3072_v63, %v3064_v31 }
 0x38c   : > { %3077 = vrcp.f32 %v1113_v62  ;;  %v1089_v26 = vsub.f32 %v3860_v38, %v1077_v61 }
 0x38d   : > { %v3876_v2 = vpop.eup %3073  ;;  %v1100_v15 = vmul.f32 1.442695, %v1088_v60  ;;  %v1148_v9 = vpack.c.bf16 %v1140_v5, %v1140_v5 }
 0x38e   : > { %v3076_v3 = vpop.eup %3075  ;;  %v1129_v4 = vsel %vm1059_vm8, %v3876_v2, 0.0  ;;  %v1102_v27 = vmul.f32 1.442695, %v1089_v26  ;;  %v2816_v26 = vld [vmem:[#allocation11 + $0x20] sm:$0xff] }
 0x38f   : > { %3079 = vpow2.f32 %v1100_v15  ;;  %1130 = vadd.xlane.f32.xlu1 %v1129_v4  ;;  %v1117_v6 = vsel %vm1059_vm8, %v3076_v3, 0.0  ;;  %v1158_v21 = vunpack.c.l.b16 %v1148_v9 }
 0x390   : > { %1118 = vadd.xlane.f32.xlu2 %v1117_v6  ;;  %3081 = vpow2.f32 %v1102_v27  ;;  %v2815_v27 = vld [vmem:[#allocation11 + $0x18] sm:$0xff] }
 0x391   : > { %946 = vrot.lane.b32.xlu0 %v3831_v25, %s3538_s28 }
 0x392   : > { %v3078_v7 = vpop.eup %3077 }
 0x393   : > { %v1141_v10 = vmul.f32 %v3078_v7, %v3066_v39  ;;  %v943_v12 = vpop.permute.xlu2 %942 }
 0x394   : > { %v1188_v14 = vunpack.c.l.b16 %v943_v12 }
 0x395   : > { %v3080_v17 = vpop.eup %3079  ;;  %v1149_v18 = vpack.c.bf16 %v1141_v10, %v1141_v10 }
 0x396   : > { %v1189_v19 = vpack.c.b16 %v1188_v14, %v1187_v13  ;;  %v1120_v20 = vsel %vm1059_vm8, %v3080_v17, 0.0  ;;  %v3082_v16 = vpop.eup %3081 }
 0x397   : > { %v1159_v23 = vunpack.c.l.b16 %v1149_v18  ;;  %1121 = vadd.xlane.f32.xlu1 %v1120_v20  ;;  %v1123_v28 = vsel %vm1059_vm8, %v3082_v16, 0.0 }
 0x398   : > { %1201 = vmatpush.bf16.msra.mxu2 %v1189_v19 }
 0x399   : > { %v1160_v24 = vpack.c.b16 %v1159_v23, %v1158_v21  ;;  %v2819_v21 = vld [vmem:[#allocation11 + $0x38] sm:$0xff]  ;;  %v2818_v23 = vld [vmem:[#allocation11 + $0x30] sm:$0xff] }
 0x39a   : > { %1361 = vmatpush.bf16.msrb.mxu1 %v2819_v21  ;;  %v2600_v21 = vld [vmem:[#allocation16 + $0xa0] sm:$0xf] }
 0x39b   : > { %2482 = vmatmul.msk.bf16.vlgmr.msrb.gmra.mxu2 %vm1059_vm8, %v1160_v24  ;;  %v2817_v24 = vld [vmem:[#allocation11 + $0x28] sm:$0xff] }
 0x39e   : > { %1362 = vmatpush.bf16.msrb.mxu1 %v2818_v23  ;;  %v2842_v23 = vld [vmem:[#allocation16 + $0xac] sm:$0xf0] }
 0x3a2   : > { %1363 = vmatpush.bf16.msrb.mxu1 %v2817_v24  ;;  %v2840_v24 = vld [vmem:[#allocation16 + $0xa4] sm:$0xf] }
 0x3a6   : > { %1364 = vmatpush.bf16.msrb.mxu1 %v2816_v26  ;;  %v2601_v26 = vor.u32 %v2842_v23, %v2600_v21  ;;  %v2546_v21 = vld [vmem:[#allocation16 + $0x38] sm:$0xf0]  ;;  %v2520_v23 = vld [vmem:[#allocation16] sm:$0xf] }
 0x3a8   : > { %948 = vrot.lane.b32.xlu2 %v3828_v22, %s3539_s24 }
 0x3aa   : > { %1365 = vmatpush.bf16.msrb.mxu1 %v2815_v27  ;;  %v2602_v27 = vld [vmem:[#allocation16 + $0xb0] sm:$0xf0] }
 0x3b0   : > { %944 = vrot.lane.b32.xlu1 %v3828_v22, %s3538_s28 }
 0x3bb   : > { %1124 = vadd.xlane.f32.xlu0 %v1123_v28  ;;  %v2813_v28 = vld [vmem:[#allocation11 + $0x8] sm:$0xff] }
 0x3cf   : > { %950 = vrot.lane.b32.xlu0 %v3831_v25, %s3539_s24 }
 0x3f0   : > { %v1116_v30 = vpop.xlane.xlu0 %1115 }
 0x3f1   : > { %3083 = vrcp.f32 %v1116_v30 }
 0x3f7   : > { %v3084_v32 = vpop.eup %3083 }
 0x3f8   : > { %v1142_v33 = vmul.f32 %v3084_v32, %v3868_v47 }
 0x3fa   : > { %v1128_v29 = vpop.xlane.xlu2 %1127  ;;  %v1150_v35 = vpack.c.bf16 %v1142_v33, %v1142_v33 }
 0x3fc   : > { %v1184_v37 = vunpack.c.l.b16 %v1150_v35 }
 0x402   : > { %v1131_v39 = vpop.xlane.xlu1 %1130 }
 0x403   : > { %v1119_v31 = vpop.xlane.xlu2 %1118  ;;  %v947_v25 = vpop.permute.xlu0 %946 }
 0x404   : > { %3085 = vrcp.f32 %v1119_v31  ;;  %v1214_v43 = vunpack.c.l.b16 %v947_v25 }
 0x40a   : > { %v3086_v34 = vpop.eup %3085  ;;  %v1122_v41 = vpop.xlane.xlu1 %1121 }
 0x40b   : > { %v1143_v36 = vmul.f32 %v3086_v34, %v3076_v3  ;;  %3087 = vrcp.f32 %v1122_v41  ;;  %v949_v61 = vpop.permute.xlu2 %948 }
 0x40c   : > { %v1239_v15 = vunpack.c.l.b16 %v949_v61  ;;  %v2634_v61 = vld [vmem:[#allocation16 + $0xf0] sm:$0xf0] }
 0x40d   : > { %v1151_v22 = vpack.c.bf16 %v1143_v36, %v1143_v36 }
 0x40f   : > { %v1185_v38 = vunpack.c.l.b16 %v1151_v22 }
 0x411   : > { %v1186_v40 = vpack.c.b16 %v1185_v38, %v1184_v37  ;;  %v3088_v47 = vpop.eup %3087 }
 0x412   : > { %v1144_v48 = vmul.f32 %v3088_v47, %v3080_v17 }
 0x413   : > { %2483 = vmatmul.msk.bf16.vlgmr.msra.gmra.mxu2 %vm1059_vm8, %v1186_v40 }
 0x414   : > { %v1152_v50 = vpack.c.bf16 %v1144_v48, %v1144_v48 }
 0x416   : > { %v1210_v55 = vunpack.c.l.b16 %v1152_v50 }
 0x41e   : > { %v1177_v9 = vpop.f32.mrf.mxu2 }
 0x422   : > { %v945_v42 = vpop.permute.xlu1 %944 }
 0x423   : > { %v1213_v44 = vunpack.c.l.b16 %v945_v42 }
 0x425   : > { %v1215_v45 = vpack.c.b16 %v1214_v43, %v1213_v44  ;;  %v3053_v44 = vld [vmem:[#allocation13] ss:$0 sm:$0xff] }
 0x427   : > { %1227 = vmatpush.bf16.msrb.mxu3 %v1215_v45 }
 0x42e   : > { %v1125_v46 = vpop.xlane.xlu0 %1124 }
 0x42f   : > { %3089 = vrcp.f32 %v1125_v46 }
 0x430   : > { %3091 = vrcp.f32 %v1131_v39 }
 0x431   : > { %3093 = vrcp.f32 %v1128_v29  ;;  %v2812_v29 = vld [vmem:[#allocation11] sm:$0xff] }
 0x435   : > { %v3090_v49 = vpop.eup %3089 }
 0x436   : > { %v1145_v51 = vmul.f32 %v3090_v49, %v3082_v16  ;;  %v3092_v52 = vpop.eup %3091  ;;  %v2814_v16 = vld [vmem:[#allocation11 + $0x10] sm:$0xff] }
 0x437   : > { %v3094_v54 = vpop.eup %3093  ;;  %v1147_v58 = vmul.f32 %v3092_v52, %v3876_v2  ;;  %v1179_v2 = vpop.f32.mrf.mxu2  ;;  %1366 = vmatpush.bf16.msrb.mxu1 %v2814_v16  ;;  %v2608_v16 = vld [vmem:[#allocation16 + $0xa8] sm:$0xf] }
 0x438   : > { %v1153_v53 = vpack.c.bf16 %v1145_v51, %v1145_v51  ;;  %v1146_v59 = vmul.f32 %v3094_v54, %v3872_v56 }
 0x439   : > { %v1155_v60 = vpack.c.bf16 %v1147_v58, %v1147_v58  ;;  %v2632_v58 = vld [vmem:[#allocation16 + $0xe0] sm:$0xf] }
 0x43a   : > { %v1211_v57 = vunpack.c.l.b16 %v1153_v53  ;;  %v1154_v62 = vpack.c.bf16 %v1146_v59, %v1146_v59  ;;  %v2848_v59 = vld [vmem:[#allocation16 + $0xe4] sm:$0xf] }
 0x43b   : > { %v1237_v4 = vunpack.c.l.b16 %v1155_v60  ;;  %1367 = vmatpush.bf16.msrb.mxu1 %v2813_v28  ;;  %v2843_v28 = vld [vmem:[#allocation16 + $0xb4] sm:$0xf0] }
 0x43c   : > { %v1212_v11 = vpack.c.b16 %v1211_v57, %v1210_v55  ;;  %v1236_v6 = vunpack.c.l.b16 %v1154_v62  ;;  %v2640_v62 = vld [vmem:[#allocation16 + $0xe8] sm:$0xf] }
 0x43e   : > { %2484 = vmatmul.msk.bf16.vlgmr.msrb.gmra.mxu3 %vm1059_vm8, %v1212_v11  ;;  %v1238_v7 = vpack.c.b16 %v1237_v4, %v1236_v6  ;;  %v2850_v11 = vld [vmem:[#allocation16 + $0xec] sm:$0xf0]  ;;  %v2849_v4 = vld [vmem:[#allocation16 + $0xec] sm:$0xf] }
 0x43f   : > { %1368 = vmatpush.bf16.msrb.mxu1 %v2812_v29  ;;  %v2633_v60 = vor.u32 %v2850_v11, %v2632_v58  ;;  %v2605_v29 = vor.u32 %v2840_v24, %v2602_v27  ;;  %v2552_v11 = vld [vmem:[#allocation16 + $0x40] sm:$0xf]  ;;  %v2822_v27 = vld [vmem:[#allocation16 + $0xc] sm:$0xf0] }
 0x441   : > { %v951_v63 = vpop.permute.xlu0 %950  ;;  %1632 = vmatpush.bf16.msrb.mxu2 %v2633_v60  ;;  %v2828_v60 = vld [vmem:[#allocation16 + $0x44] sm:$0xf] }
 0x442   : > { %v1240_v3 = vunpack.c.l.b16 %v951_v63  ;;  %v2851_v63 = vld [vmem:[#allocation16 + $0xf4] sm:$0xf0] }
 0x444   : > { %v1241_v5 = vpack.c.b16 %v1240_v3, %v1239_v15  ;;  %v2637_v15 = vor.u32 %v2848_v59, %v2634_v61  ;;  %v2641_v3 = vor.u32 %v2851_v63, %v2640_v62  ;;  %v2830_v59 = vld [vmem:[#allocation16 + $0x4c] sm:$0xf0]  ;;  %v2554_v62 = vld [vmem:[#allocation16 + $0x50] sm:$0xf0]  ;;  %v2560_v63 = vld [vmem:[#allocation16 + $0x48] sm:$0xf] }
 0x445   : > { %v2553_v61 = vor.u32 %v2830_v59, %v2552_v11  ;;  %v3055_v11 = vld [vmem:[%s4160_s9] ss:$0 sm:$0xff] }
 0x446   : > { %1253 = vmatpush.bf16.msra.mxu0 %v1241_v5  ;;  %v2642_v5 = vld [vmem:[#allocation16 + $0xf8] sm:$0xf0]  ;;  %1646 = vmatpush.bf16.msra.mxu3 %v2637_v15  ;;  %v2831_v15 = vld [vmem:[#allocation16 + $0x54] sm:$0xf0] }
 0x447   : > { %v2645_v6 = vor.u32 %v2849_v4, %v2642_v5  ;;  %v2561_v4 = vor.u32 %v2831_v15, %v2560_v63  ;;  %v2829_v5 = vld [vmem:[#allocation16 + $0x4c] sm:$0xf]  ;;  %v2875_v63 = vld [vmem:[#allocation17 + $0xb8] sm:$0xff] }
 0x449   : > { %2485 = vmatmul.msk.bf16.vlgmr.msra.gmra.mxu0 %vm1059_vm8, %v1238_v7  ;;  %v2616_v7 = vld [vmem:[#allocation16 + $0xc0] sm:$0xf]  ;;  %1674 = vmatpush.bf16.msra.mxu1 %v2645_v6  ;;  %v2562_v6 = vld [vmem:[#allocation16 + $0x58] sm:$0xf0] }
 0x44a   : > { %1660 = vmatpush.bf16.msrb.mxu0 %v2641_v3  ;;  %v2557_v3 = vor.u32 %v2828_v60, %v2554_v62 }
 0x496   : > { %v1203_v10 = vpop.f32.mrf.mxu2 }
 0x49e   : > { %v1205_v12 = vpop.f32.mrf.mxu2 }
 0x49f   : > { %v3036_v56 = vpack.i.bf16 %v1205_v12, %v1203_v10  ;;  %v2618_v12 = vld [vmem:[#allocation16 + $0xd0] sm:$0xf0] }
 0x4a1   : > { %3037 = vrot.lane.b32.xlu1 %v3036_v56, %s3539_s24  ;;  %v2624_v56 = vld [vmem:[#allocation16 + $0xc8] sm:$0xf] }
 0x4c1   : > { %v1229_v13 = vpop.f32.mrf.mxu3 }
 0x4c6   : > { %v1255_v14 = vpop.f32.mrf.mxu0 }
 0x4c9   : > { %v1231_v17 = vpop.f32.mrf.mxu3 }
 0x4ca   : > { %v3041_v18 = vpack.i.bf16 %v1231_v17, %v1229_v13  ;;  %v2847_v13 = vld [vmem:[#allocation16 + $0xd4] sm:$0xf0] }
 0x4cb   : > { %v2625_v17 = vor.u32 %v2847_v13, %v2624_v56  ;;  %v2538_v56 = vld [vmem:[#allocation16 + $0x30] sm:$0xf0]  ;;  %v2544_v13 = vld [vmem:[#allocation16 + $0x28] sm:$0xf] }
 0x4cc   : > { %3042 = vrot.lane.b32.xlu2 %v3041_v18, %s3538_s28  ;;  %v2845_v18 = vld [vmem:[#allocation16 + $0xcc] sm:$0xf]  ;;  %s4208_s28 = sld [smem:[#allocation34_spill]] }
 0x4cd   : > { %1661 = vmatpush.bf16.msrb.mxu0 %v2625_v17 }
 0x4ce   : > { %v1257_v19 = vpop.f32.mrf.mxu0 }
 0x4cf   : > { %v3046_v20 = vpack.i.bf16 %v1257_v19, %v1255_v14  ;;  %v2626_v19 = vld [vmem:[#allocation16 + $0xd8] sm:$0xf0] }
 0x4d1   : > { %3047 = vrot.lane.b32.xlu0 %v3046_v20, %s3537_s23  ;;  %v2629_v20 = vor.u32 %v2845_v18, %v2626_v19 }
 0x4d2   : > { %s2192_s24 = scalar_lea.hbm %s4208_s28, %s2884_s14  ;;  %s3451_s1 = scalar_lea.hbm %s4208_s28, 32 }
 0x4d3   : > { %1675 = vmatpush.bf16.msra.mxu1 %v2629_v20  ;;  %v2825_v20 = vld [vmem:[#allocation16 + $0x2c] sm:$0xf]  ;;  %s2195_s25 = sshll.u32 %s2192_s24, 4  ;;  %s2196_s25 = int_to_ptr.hbm [resolvable:$true] %s2195_s25 }
 0x4d4   : > { %s3445_s2 = sshra.s32 %s2196_s25, 4  ;;  %s3446_s2 = int_to_ptr.hbm [resolvable:$true] %s3445_s2 }
 0x4d5   : > { %s3447_s19 = scalar_lea.hbm %s3446_s2, 16  ;;  %p3452_p12 = scmp.lt.s32.totalorder %s3446_s2, %s4208_s28 }
 0x4d6   : > { %p3448_p1 = scmp.ne.s32.totalorder %s3446_s2, %s3447_s19  ;;  %p3453_p8 = scmp.lt.s32.totalorder %s3451_s1, %s3447_s19 }
 0x4d8   : > { %p3449_p3 = pnand %p3448_p1, %p3732_p13  ;;  %p3454_p7 = por %p3453_p8, %p3452_p12 }
 0x4da   : > { %p3450_p5 = pneg %p3449_p3 }
 0x4dc   : > { %p3455_p9 = pnand %p3454_p7, %p3450_p5 }
 0x513   : > { %v3038_v30 = vpop.permute.xlu1 %3037 }
 0x514   : > { %v3040_v32 = vunpack.i.h.bf16 %v3038_v30  ;;  %v3039_v33 = vunpack.i.l.bf16 %v3038_v30  ;;  %v2609_v30 = vor.u32 %v2843_v28, %v2608_v16  ;;  %v2820_v16 = vld [vmem:[#allocation16 + $0x4] sm:$0xf]  ;;  %v2522_v28 = vld [vmem:[#allocation16 + $0x10] sm:$0xf0] }
 0x516   : > { %v1285_v22 = vsel %vm960_vm7, %v1179_v2, %v3040_v32  ;;  %v1284_v37 = vsel %vm960_vm7, %v1177_v9, %v3039_v33  ;;  %v2846_v9 = vld [vmem:[#allocation16 + $0xcc] sm:$0xf0]  ;;  %v2844_v2 = vld [vmem:[#allocation16 + $0xc4] sm:$0xf]  ;;  %v2610_v32 = vld [vmem:[#allocation16 + $0xb8] sm:$0xf0]  ;;  %1662 = vmatpush.bf16.msrb.mxu0 %v2609_v30  ;;  %v2525_v30 = vor.u32 %v2820_v16, %v2522_v28 }
 0x517   : > { %v2617_v10 = vor.u32 %v2846_v9, %v2616_v7  ;;  %v2621_v14 = vor.u32 %v2844_v2, %v2618_v12  ;;  %v2565_v7 = vor.u32 %v2829_v5, %v2562_v6  ;;  %v2536_v9 = vld [vmem:[#allocation16 + $0x20] sm:$0xf]  ;;  %v2826_v2 = vld [vmem:[#allocation16 + $0x2c] sm:$0xf0] }
 0x518   : > { %v2537_v12 = vor.u32 %v2826_v2, %v2536_v9  ;;  %v2882_v5 = vld [vmem:[#allocation17 + $0xf0] sm:$0xff] }
 0x519   : > { %1633 = vmatpush.bf16.msrb.mxu2 %v2617_v10  ;;  %1647 = vmatpush.bf16.msra.mxu3 %v2621_v14  ;;  %v2824_v10 = vld [vmem:[#allocation16 + $0x24] sm:$0xf]  ;;  %v2827_v14 = vld [vmem:[#allocation16 + $0x34] sm:$0xf0] }
 0x51a   : > { %v2541_v18 = vor.u32 %v2824_v10, %v2538_v56  ;;  %v2545_v19 = vor.u32 %v2827_v14, %v2544_v13  ;;  %v2859_v10 = vld [vmem:[#allocation17 + $0x38] sm:$0xff] }
 0x51d   : > { %1634 = vmatpush.bf16.msrb.mxu2 %v2601_v26  ;;  %1648 = vmatpush.bf16.msra.mxu3 %v2605_v29  ;;  %v2549_v26 = vor.u32 %v2825_v20, %v2546_v21  ;;  %v2521_v29 = vor.u32 %v2822_v27, %v2520_v23  ;;  %v2866_v27 = vld [vmem:[#allocation17 + $0x70] sm:$0xff] }
 0x526   : > { %v3043_v31 = vpop.permute.xlu2 %3042 }
 0x527   : > { %v3045_v34 = vunpack.i.h.bf16 %v3043_v31  ;;  %v3044_v35 = vunpack.i.l.bf16 %v3043_v31  ;;  %v2841_v31 = vld [vmem:[#allocation16 + $0xac] sm:$0xf] }
 0x528   : > { %v2613_v33 = vor.u32 %v2841_v31, %v2610_v32  ;;  %v2528_v31 = vld [vmem:[#allocation16 + $0x8] sm:$0xf]  ;;  %v2823_v32 = vld [vmem:[#allocation16 + $0x14] sm:$0xf0] }
 0x529   : > { %v1287_v40 = vsel %vm1286_vm9, %v1284_v37, %v3044_v35  ;;  %v1288_v41 = vsel %vm1286_vm9, %v1285_v22, %v3045_v34  ;;  %v2584_v34 = vld [vmem:[#allocation16 + $0x80] sm:$0xf]  ;;  %v2838_v35 = vld [vmem:[#allocation16 + $0x8c] sm:$0xf0]  ;;  %v2586_v37 = vld [vmem:[#allocation16 + $0x90] sm:$0xf0] }
 0x52a   : > { %1676 = vmatpush.bf16.msra.mxu1 %v2613_v33  ;;  %v2585_v22 = vor.u32 %v2838_v35, %v2584_v34  ;;  %v2821_v33 = vld [vmem:[#allocation16 + $0xc] sm:$0xf]  ;;  %v2529_v35 = vor.u32 %v2823_v32, %v2528_v31 }
 0x52c   : > { %1635 = vmatpush.bf16.msrb.mxu2 %v2585_v22 }
 0x543   : > { %v3048_v36 = vpop.permute.xlu0 %3047 }
 0x544   : > { %v3050_v38 = vunpack.i.h.bf16 %v3048_v36  ;;  %v3049_v39 = vunpack.i.l.bf16 %v3048_v36  ;;  %v2836_v36 = vld [vmem:[#allocation16 + $0x84] sm:$0xf] }
 0x546   : > { %v1290_v25 = vsel %vm1289_vm10, %v1287_v40, %v3049_v39  ;;  %v1291_v42 = vsel %vm1289_vm10, %v1288_v41, %v3050_v38  ;;  %v2592_v38 = vld [vmem:[#allocation16 + $0x88] sm:$0xf]  ;;  %v2839_v39 = vld [vmem:[#allocation16 + $0x94] sm:$0xf0]  ;;  %v2589_v40 = vor.u32 %v2836_v36, %v2586_v37  ;;  %v2530_v36 = vld [vmem:[#allocation16 + $0x18] sm:$0xf0] }
 0x547   : > { %v1292_v43 = vpack.c.bf16 %v1291_v42, %v1290_v25  ;;  %v2593_v41 = vor.u32 %v2839_v39, %v2592_v38  ;;  %v2837_v25 = vld [vmem:[#allocation16 + $0x8c] sm:$0xf]  ;;  %v2594_v42 = vld [vmem:[#allocation16 + $0x98] sm:$0xf0]  ;;  %v2533_v22 = vor.u32 %v2821_v33, %v2530_v36 }
 0x548   : > { %1649 = vmatpush.bf16.msra.mxu3 %v2589_v40 }
 0x549   : > { %1369 = vmatmul.bf16.vlgmr.msrb.gmra.mxu1 %v1292_v43  ;;  %v2597_v43 = vor.u32 %v2837_v25, %v2594_v42  ;;  %1663 = vmatpush.bf16.msrb.mxu0 %v2593_v41 }
 0x54b   : > { %1677 = vmatpush.bf16.msra.mxu1 %v2597_v43 }
 0x5c6   : > { %v1370_v45 = vpop.f32.mrf.mxu1 }
 0x5c7   : > { %v1371_v46 = vadd.f32 %v3053_v44, %v1370_v45  ;;  %v2834_v45 = vld [vmem:[#allocation16 + $0x6c] sm:$0xf0] }
 0x5c9   : > { %v3906_v47 = vadd.f32 %v1371_v46, %v3796_v0  ;;  %v2832_v46 = vld [vmem:[#allocation16 + $0x64] sm:$0xf] }
 0x5cb   : > { %1379 = vadd.xlane.f32.xlu1 %v3906_v47 }
 0x5ce   : > { %v1372_v48 = vpop.f32.mrf.mxu1 }
 0x5cf   : > { %v1373_v49 = vadd.f32 %v3053_v44, %v1372_v48  ;;  %v2568_v44 = vld [vmem:[#allocation16 + $0x60] sm:$0xf] }
 0x5d0   : > { %v2569_v48 = vor.u32 %v2834_v45, %v2568_v44 }
 0x5d1   : > { %v3910_v50 = vadd.f32 %v1373_v49, %v3799_v1  ;;  %v2570_v49 = vld [vmem:[#allocation16 + $0x70] sm:$0xf0] }
 0x5d2   : > { %1636 = vmatpush.bf16.msrb.mxu2 %v2569_v48 }
 0x5d3   : > { %1381 = vadd.xlane.f32.xlu2 %v3910_v50 }
 0x5d6   : > { %1637 = vmatpush.bf16.msrb.mxu2 %v2553_v61 }
 0x5da   : > { %1638 = vmatpush.bf16.msrb.mxu2 %v2537_v12  ;;  %v2867_v12 = vld [vmem:[#allocation17 + $0x78] sm:$0xff] }
 0x5de   : > { %1639 = vmatpush.bf16.msrb.mxu2 %v2521_v29  ;;  %v2872_v29 = vld [vmem:[#allocation17 + $0xa0] sm:$0xff] }
 0x5e2   : > { %2120 = vmatpush.bf16.msra.mxu2 %v2859_v10 }
 0x63e   : > { %v1380_v51 = vpop.xlane.xlu1 %1379 }
 0x63f   : > { %v1383_v52 = vmul.f32 %v1380_v51, %v3802_v8  ;;  %v2576_v51 = vld [vmem:[#allocation16 + $0x68] sm:$0xf] }
 0x641   : > { %v3915_v53 = vsub.f32 %v3906_v47, %v1383_v52  ;;  %v2835_v52 = vld [vmem:[#allocation16 + $0x74] sm:$0xf0] }
 0x643   : > { %v1387_v54 = vmul.f32 %v3915_v53, %v3915_v53 }
 0x645   : > { %1389 = vadd.xlane.f32.xlu0 %v1387_v54  ;;  %v2573_v54 = vor.u32 %v2832_v46, %v2570_v49 }
 0x646   : > { %v1382_v0 = vpop.xlane.xlu2 %1381 }
 0x647   : > { %v1384_v55 = vmul.f32 %v1382_v0, %v3802_v8  ;;  %v2577_v0 = vor.u32 %v2835_v52, %v2576_v51  ;;  %1650 = vmatpush.bf16.msra.mxu3 %v2573_v54  ;;  %v3054_v54 = vld [vmem:[#allocation14] ss:$0 sm:$0xff] }
 0x649   : > { %v3921_v57 = vsub.f32 %v3910_v50, %v1384_v55  ;;  %v2833_v55 = vld [vmem:[#allocation16 + $0x6c] sm:$0xf]  ;;  %1664 = vmatpush.bf16.msrb.mxu0 %v2577_v0 }
 0x64b   : > { %v1388_v1 = vmul.f32 %v3921_v57, %v3921_v57  ;;  %1651 = vmatpush.bf16.msra.mxu3 %v2557_v3 }
 0x64d   : > { %1391 = vadd.xlane.f32.xlu1 %v1388_v1  ;;  %v2578_v1 = vld [vmem:[#allocation16 + $0x78] sm:$0xf0]  ;;  %1665 = vmatpush.bf16.msrb.mxu0 %v2561_v4  ;;  %v2874_v4 = vld [vmem:[#allocation17 + $0xb0] sm:$0xff] }
 0x64e   : > { %v2581_v58 = vor.u32 %v2833_v55, %v2578_v1 }
 0x64f   : > { %1652 = vmatpush.bf16.msra.mxu3 %v2541_v18  ;;  %v2873_v18 = vld [vmem:[#allocation17 + $0xa8] sm:$0xff] }
 0x650   : > { %1678 = vmatpush.bf16.msra.mxu1 %v2581_v58 }
 0x651   : > { %1666 = vmatpush.bf16.msrb.mxu0 %v2545_v19  ;;  %v2881_v19 = vld [vmem:[#allocation17 + $0xe8] sm:$0xff] }
 0x653   : > { %1653 = vmatpush.bf16.msra.mxu3 %v2525_v30  ;;  %v2880_v30 = vld [vmem:[#allocation17 + $0xe0] sm:$0xff] }
 0x654   : > { %1679 = vmatpush.bf16.msra.mxu1 %v2565_v7 }
 0x655   : > { %1667 = vmatpush.bf16.msrb.mxu0 %v2529_v35 }
 0x657   : > { %2134 = vmatpush.bf16.msrb.mxu3 %v2867_v12 }
 0x658   : > { %1680 = vmatpush.bf16.msra.mxu1 %v2549_v26  ;;  %v2858_v26 = vld [vmem:[#allocation17 + $0x30] sm:$0xff] }
 0x659   : > { %2148 = vmatpush.bf16.msra.mxu0 %v2875_v63  ;;  %2121 = vmatpush.bf16.msra.mxu2 %v2858_v26 }
 0x65b   : > { %2135 = vmatpush.bf16.msrb.mxu3 %v2866_v27 }
 0x65c   : > { %1681 = vmatpush.bf16.msra.mxu1 %v2533_v22  ;;  %v2857_v22 = vld [vmem:[#allocation17 + $0x28] sm:$0xff] }
 0x65d   : > { %2149 = vmatpush.bf16.msra.mxu0 %v2874_v4  ;;  %2122 = vmatpush.bf16.msra.mxu2 %v2857_v22  ;;  %v2862_v4 = vld [vmem:[#allocation17 + $0x50] sm:$0xff] }
 0x661   : > { %2150 = vmatpush.bf16.msra.mxu0 %v2873_v18 }
 0x665   : > { %2151 = vmatpush.bf16.msra.mxu0 %v2872_v29 }
 0x6b8   : > { %v1390_v17 = vpop.xlane.xlu0 %1389 }
 0x6b9   : > { %v1393_v24 = vmul.f32 %v1390_v17, %v3802_v8 }
 0x6bb   : > { %v1395_v34 = vadd.f32 1e-05, %v1393_v24 }
 0x6bd   : > { %3095 = vrsqrt.f32 %v1395_v34  ;;  %vm1403_vm12 = vweird.f32 %v1395_v34 }
 0x6c0   : > { %v1392_v37 = vpop.xlane.xlu1 %1391 }
 0x6c1   : > { %v1394_v38 = vmul.f32 %v1392_v37, %v3802_v8  ;;  %v2865_v37 = vld [vmem:[#allocation17 + $0x68] sm:$0xff] }
 0x6c2   : > { %2136 = vmatpush.bf16.msrb.mxu3 %v2865_v37 }
 0x6c3   : > { %v3096_v39 = vpop.eup %3095  ;;  %v1396_v40 = vadd.f32 1e-05, %v1394_v38 }
 0x6c4   : > { %v1398_v41 = vmul.f32 %v3096_v39, %v1395_v34  ;;  %vm1404_vm11 = vweird.f32 %v3096_v39 }
 0x6c5   : > { %3097 = vrsqrt.f32 %v1396_v40  ;;  %vm1405_vm13 = vmor %vm1403_vm12, %vm1404_vm11  ;;  %vm1413_vm15 = vweird.f32 %v1396_v40 }
 0x6c6   : > { %v1399_v25 = vmul.f32 %v3096_v39, %v1398_v41 }
 0x6c8   : > { %v1400_v42 = vmul.f32 0.5, %v1399_v25  ;;  %v2871_v25 = vld [vmem:[#allocation17 + $0x98] sm:$0xff] }
 0x6c9   : > { %2152 = vmatpush.bf16.msra.mxu0 %v2871_v25 }
 0x6ca   : > { %v1401_v43 = vsub.f32 1.5, %v1400_v42  ;;  %v2879_v42 = vld [vmem:[#allocation17 + $0xd8] sm:$0xff] }
 0x6cb   : > { %v3098_v44 = vpop.eup %3097 }
 0x6cc   : > { %v1402_v45 = vmul.f32 %v3096_v39, %v1401_v43  ;;  %v1408_v46 = vmul.f32 %v3098_v44, %v1396_v40  ;;  %vm1414_vm14 = vweird.f32 %v3098_v44 }
 0x6cd   : > { %vm1415_vm0 = vmor %vm1413_vm15, %vm1414_vm14 }
 0x6ce   : > { %v1409_v48 = vmul.f32 %v3098_v44, %v1408_v46  ;;  %v1406_v49 = vsel %vm1405_vm13, %v3096_v39, %v1402_v45  ;;  %v2856_v46 = vld [vmem:[#allocation17 + $0x20] sm:$0xff] }
 0x6cf   : > { %v1417_v8 = vmul.f32 %v1406_v49, %v3915_v53  ;;  %v3935_v53 = vld [vmem:[%s4162_s11] sm:$0xf]  ;;  %2123 = vmatpush.bf16.msra.mxu2 %v2856_v46 }
 0x6d0   : > { %v1410_v51 = vmul.f32 0.5, %v1409_v48  ;;  %v1466_v15 = vperm.slane %v3935_v53, 2  ;;  %v1467_v3 = vperm.slane %v3935_v53, 3  ;;  %v1464_v56 = vperm.slane %v3935_v53, 0  ;;  %v2864_v48 = vld [vmem:[#allocation17 + $0x60] sm:$0xff] }
 0x6d1   : > { %v1422_v58 = vmul.f32 %v3054_v54, %v1417_v8  ;;  %v1465_v13 = vperm.slane %v3935_v53, 1  ;;  %2137 = vmatpush.bf16.msrb.mxu3 %v2864_v48 }
 0x6d2   : > { %v1411_v52 = vsub.f32 1.5, %v1410_v51 }
 0x6d3   : > { %v1427_v60 = vadd.f32 %v3055_v11, %v1422_v58  ;;  %v2863_v58 = vld [vmem:[#allocation17 + $0x58] sm:$0xff] }
 0x6d4   : > { %v1412_v0 = vmul.f32 %v3098_v44, %v1411_v52 }
 0x6d5   : > { %2138 = vmatpush.bf16.msrb.mxu3 %v2863_v58 }
 0x6d6   : > { %v1416_v55 = vsel %vm1415_vm0, %v3098_v44, %v1412_v0  ;;  %v2870_v0 = vld [vmem:[#allocation17 + $0x90] sm:$0xff] }
 0x6d7   : > { %v1418_v1 = vmul.f32 %v1416_v55, %v3921_v57  ;;  %v2883_v57 = vld [vmem:[#allocation17 + $0xf8] sm:$0xff]  ;;  %v2878_v55 = vld [vmem:[#allocation17 + $0xd0] sm:$0xff]  ;;  %2153 = vmatpush.bf16.msra.mxu0 %v2870_v0 }
 0x6d8   : > { %2162 = vmatpush.bf16.msrb.mxu1 %v2883_v57  ;;  %v2877_v57 = vld [vmem:[#allocation17 + $0xc8] sm:$0xff] }
 0x6d9   : > { %v1423_v59 = vmul.f32 %v3054_v54, %v1418_v1  ;;  %v2855_v1 = vld [vmem:[#allocation17 + $0x18] sm:$0xff]  ;;  %2139 = vmatpush.bf16.msrb.mxu3 %v2862_v4 }
 0x6da   : > { %2124 = vmatpush.bf16.msra.mxu2 %v2855_v1 }
 0x6db   : > { %v1428_v61 = vadd.f32 %v3055_v11, %v1423_v59 }
 0x6dc   : > { %2163 = vmatpush.bf16.msrb.mxu1 %v2882_v5 }
 0x6dd   : > { %v1429_v62 = vpack.c.bf16 %v1428_v61, %v1427_v60  ;;  %v2869_v61 = vld [vmem:[#allocation17 + $0x88] sm:$0xff] }
 0x6de   : > { %2154 = vmatpush.bf16.msra.mxu0 %v2869_v61 }
 0x6df   : > { %1640 = vmatmul.bf16.vlgmr.msrb.gmra.mxu2 %v1429_v62  ;;  %1654 = vmatmul.bf16.vlgmr.msra.gmra.mxu3 %v1429_v62 }
 0x6e0   : > { %1668 = vmatmul.bf16.vlgmr.msrb.gmra.mxu0 %v1429_v62  ;;  %1682 = vmatmul.bf16.vlgmr.msra.gmra.mxu1 %v1429_v62 }
 0x6e1   : > { %2164 = vmatpush.bf16.msrb.mxu1 %v2881_v19 }
 0x6e5   : > { %2165 = vmatpush.bf16.msrb.mxu1 %v2880_v30 }
 0x6e9   : > { %2166 = vmatpush.bf16.msrb.mxu1 %v2879_v42 }
 0x6ed   : > { %2167 = vmatpush.bf16.msrb.mxu1 %v2878_v55 }
 0x6f1   : > { %2168 = vmatpush.bf16.msrb.mxu1 %v2877_v57 }
 0x75d   : > { %v1669_v6 = vpop.f32.mrf.mxu0  ;;  %v1683_v7 = vpop.f32.mrf.mxu1 }
 0x75e   : > { %v3939_v9 = vadd.f32 %v1669_v6, %v1466_v15  ;;  %v3941_v2 = vadd.f32 %v1683_v7, %v1467_v3 }
 0x760   : > { %v2648_v14 = vmul.f32 -1.702, %v3939_v9  ;;  %v2649_v17 = vmul.f32 -1.702, %v3941_v2 }
 0x762   : > { %v1708_v20 = vmul.f32 1.442695, %v2648_v14  ;;  %v1710_v21 = vmul.f32 1.442695, %v2649_v17  ;;  %v1641_v23 = vpop.f32.mrf.mxu2  ;;  %v1655_v24 = vpop.f32.mrf.mxu3  ;;  %v2876_v14 = vld [vmem:[#allocation17 + $0xc0] sm:$0xff] }
 0x763   : > { %v3947_v16 = vadd.f32 %v1641_v23, %v1464_v56  ;;  %v3951_v28 = vadd.f32 %v1655_v24, %v1465_v13  ;;  %v2853_v23 = vld [vmem:[#allocation17 + $0x8] sm:$0xff]  ;;  %2169 = vmatpush.bf16.msrb.mxu1 %v2876_v14 }
 0x764   : > { %3099 = vpow2.f32 %v1708_v20  ;;  %v2861_v24 = vld [vmem:[#allocation17 + $0x48] sm:$0xff] }
 0x765   : > { %3101 = vpow2.f32 %v1710_v21  ;;  %v2646_v31 = vmul.f32 -1.702, %v3947_v16  ;;  %v2647_v32 = vmul.f32 -1.702, %v3951_v28  ;;  %v1671_v33 = vpop.f32.mrf.mxu0  ;;  %v1685_v34 = vpop.f32.mrf.mxu1  ;;  %2140 = vmatpush.bf16.msrb.mxu3 %v2861_v24 }
 0x766   : > { %v3955_v35 = vadd.f32 %v1671_v33, %v1466_v15  ;;  %v3957_v36 = vadd.f32 %v1685_v34, %v1467_v3  ;;  %v2854_v3 = vld [vmem:[#allocation17 + $0x10] sm:$0xff] }
 0x767   : > { %v1704_v38 = vmul.f32 1.442695, %v2646_v31  ;;  %v1706_v39 = vmul.f32 1.442695, %v2647_v32  ;;  %2125 = vmatpush.bf16.msra.mxu2 %v2854_v3  ;;  %v2852_v31 = vld [vmem:[#allocation17] sm:$0xff] }
 0x768   : > { %v2652_v40 = vmul.f32 -1.702, %v3955_v35  ;;  %v2653_v41 = vmul.f32 -1.702, %v3957_v36  ;;  %v2860_v32 = vld [vmem:[#allocation17 + $0x40] sm:$0xff] }
 0x769   : > { %3103 = vpow2.f32 %v1704_v38  ;;  %2141 = vmatpush.bf16.msrb.mxu3 %v2860_v32 }
 0x76a   : > { %v3100_v43 = vpop.eup %3099  ;;  %v1716_v44 = vmul.f32 1.442695, %v2652_v40  ;;  %v1643_v45 = vpop.f32.mrf.mxu2  ;;  %3105 = vpow2.f32 %v1706_v39  ;;  %v1718_v52 = vmul.f32 1.442695, %v2653_v41 }
 0x76b   : > { %v3102_v49 = vpop.eup %3101  ;;  %v3961_v51 = vadd.f32 1.0, %v3100_v43  ;;  %v3963_v8 = vadd.f32 %v1643_v45, %v1464_v56  ;;  %v1657_v63 = vpop.f32.mrf.mxu3  ;;  %v2868_v56 = vld [vmem:[#allocation17 + $0x80] sm:$0xff]  ;;  %2126 = vmatpush.bf16.msra.mxu2 %v2853_v23 }
 0x76c   : > { %v3965_v54 = vadd.f32 1.0, %v3102_v49  ;;  %3107 = vpow2.f32 %v1716_v44  ;;  %v3981_v12 = vadd.f32 %v1657_v63, %v1465_v13  ;;  %2155 = vmatpush.bf16.msra.mxu0 %v2868_v56 }
 0x76d   : > { %3109 = vrcp.f32 %v3961_v51  ;;  %v2650_v59 = vmul.f32 -1.702, %v3963_v8  ;;  %v1767_v30 = vand.u32 2147483647, %v3961_v51  ;;  %v1769_v33 = vand.u32 2147483648, %v3961_v51 }
 0x76e   : > { %3111 = vrcp.f32 %v3965_v54  ;;  %v2651_v53 = vmul.f32 -1.702, %v3981_v12  ;;  %v1782_v34 = vand.u32 2147483647, %v3965_v54  ;;  %v1784_v22 = vand.u32 2147483648, %v3965_v54 }
 0x76f   : > { %v3104_v11 = vpop.eup %3103  ;;  %3113 = vpow2.f32 %v1718_v52  ;;  %v1712_v6 = vmul.f32 1.442695, %v2650_v59  ;;  %2127 = vmatpush.bf16.msra.mxu2 %v2852_v31  ;;  %vm1763_vm2 = vweird.f32 %v3961_v51  ;;  %vm4008_vm3 = vcmp.eq.f32.partialorder %v1767_v30, 8.507059e+37 }
 0x770   : > { %v3970_v60 = vadd.f32 1.0, %v3104_v11  ;;  %v3106_v62 = vpop.eup %3105  ;;  %v1714_v37 = vmul.f32 1.442695, %v2651_v53  ;;  %vm1778_vm4 = vweird.f32 %v3965_v54  ;;  %v1770_v43 = vor.u32 1.1754944e-38, %v1769_v33 }
 0x771   : > { %v3985_v20 = vadd.f32 1.0, %v3106_v62  ;;  %vm4013_vm5 = vcmp.eq.f32.partialorder %v1782_v34, 8.507059e+37  ;;  %v1785_v45 = vor.u32 1.1754944e-38, %v1784_v22 }
 0x772   : > { %v3108_v15 = vpop.eup %3107  ;;  %3115 = vrcp.f32 %v3970_v60  ;;  %v1739_v59 = vand.u32 2147483648, %v3970_v60  ;;  %v1737_v34 = vand.u32 2147483647, %v3970_v60 }
 0x773   : > { %v3972_v5 = vpop.eup %3109  ;;  %v3987_v21 = vadd.f32 1.0, %v3108_v15  ;;  %3117 = vpow2.f32 %v1712_v6 }
 0x774   : > { %v3974_v7 = vpop.eup %3111  ;;  %v1759_v10 = vmul.f32 %v3972_v5, %v3961_v51  ;;  %vm1764_vm1 = vweird.f32 %v3972_v5 }
 0x775   : > { %v3114_v17 = vpop.eup %3113  ;;  %v1774_v18 = vmul.f32 %v3974_v7, %v3965_v54  ;;  %3119 = vrcp.f32 %v3987_v21  ;;  %vm4020_vm6 = vmor %vm1763_vm2, %vm1764_vm1  ;;  %vm1779_vm7 = vweird.f32 %v3974_v7  ;;  %v1827_v51 = vand.u32 2147483647, %v3987_v21 }
 0x776   : > { %v1760_v19 = vsub.f32 1.0, %v1759_v10  ;;  %v3989_v26 = vadd.f32 1.0, %v3114_v17  ;;  %3121 = vrcp.f32 %v3985_v20  ;;  %vm1823_vm8 = vweird.f32 %v3987_v21  ;;  %vm4045_vm10 = vmor %vm1778_vm4, %vm1779_vm7 }
 0x777   : > { %v1775_v27 = vsub.f32 1.0, %v1774_v18  ;;  %v1829_v61 = vand.u32 2147483648, %v3987_v21  ;;  %vm4050_vm12 = vcmp.eq.f32.partialorder %v1827_v51, 8.507059e+37  ;;  %vm1733_vm1 = vweird.f32 %v3970_v60 }
 0x778   : > { %v1761_v13 = vmul.f32 %v3972_v5, %v1760_v19  ;;  %v3994_v29 = vpop.eup %3115  ;;  %3123 = vrcp.f32 %v3989_v26  ;;  %v1844_v54 = vand.u32 2147483648, %v3989_v26  ;;  %v1842_v19 = vand.u32 2147483647, %v3989_v26 }
 0x779   : > { %v3118_v38 = vpop.eup %3117  ;;  %v1776_v40 = vmul.f32 %v3974_v7, %v1775_v27  ;;  %v1729_v41 = vmul.f32 %v3994_v29, %v3970_v60  ;;  %3125 = vpow2.f32 %v1714_v37  ;;  %vm1734_vm11 = vweird.f32 %v3994_v29 }
 0x77a   : > { %v1762_v39 = vadd.f32 %v3972_v5, %v1761_v13  ;;  %v4026_v52 = vadd.f32 1.0, %v3118_v38  ;;  %v1830_v17 = vor.u32 1.1754944e-38, %v1829_v61  ;;  %vm1838_vm15 = vweird.f32 %v3989_v26 }
 0x77b   : > { %v3120_v25 = vpop.eup %3119  ;;  %v1777_v1 = vadd.f32 %v3974_v7, %v1776_v40  ;;  %v1730_v58 = vsub.f32 1.0, %v1729_v41  ;;  %v1845_v33 = vor.u32 1.1754944e-38, %v1844_v54  ;;  %vm1843_vm2 = vcmp.eq.f32.partialorder %v1842_v19, 8.507059e+37  ;;  %v3056_v54 = vld [vmem:[%s4207_s4] ss:$0 sm:$0xff] }
 0x77c   : > { %v1819_v46 = vmul.f32 %v3120_v25, %v3987_v21  ;;  %v4018_v48 = vpop.eup %3121  ;;  %v1766_v55 = vsel %vm4020_vm6, %v3972_v5, %v1762_v39  ;;  %vm1824_vm9 = vweird.f32 %v3120_v25  ;;  %3127 = vrcp.f32 %v4026_v52 }
 0x77d   : > { %v1744_v63 = vmul.f32 %v4018_v48, %v3985_v20  ;;  %v1771_v15 = vsel %vm4008_vm3, %v1770_v43, %v1766_v55  ;;  %v1781_v6 = vsel %vm4045_vm10, %v3974_v7, %v1777_v1  ;;  %v1731_v10 = vmul.f32 %v3994_v29, %v1730_v58  ;;  %vm1825_vm13 = vmor %vm1823_vm8, %vm1824_vm9 }
 0x77e   : > { %v3124_v0 = vpop.eup %3123  ;;  %v1820_v11 = vsub.f32 1.0, %v1819_v46  ;;  %v1850_v7 = vmul.f32 %v1771_v15, %v3939_v9  ;;  %v1786_v13 = vsel %vm4013_vm5, %v1785_v45, %v1781_v6  ;;  %vm4080_vm3 = vmor %vm1733_vm1, %vm1734_vm11  ;;  %v1740_v60 = vor.u32 1.1754944e-38, %v1739_v59 }
 0x77f   : > { %v1834_v62 = vmul.f32 %v3124_v0, %v3989_v26  ;;  %v3126_v14 = vpop.eup %3125  ;;  %vm1839_vm14 = vweird.f32 %v3124_v0  ;;  %v1745_v23 = vsub.f32 1.0, %v1744_v63  ;;  %v1732_v31 = vadd.f32 %v3994_v29, %v1731_v10 }
 0x780   : > { %v1821_v57 = vmul.f32 %v3120_v25, %v1820_v11  ;;  %v4063_v53 = vadd.f32 1.0, %v3126_v14  ;;  %vm1840_vm0 = vmor %vm1838_vm15, %vm1839_vm14  ;;  %v1851_v39 = vmul.f32 %v1786_v13, %v3941_v2  ;;  %v1799_v42 = vand.u32 2147483648, %v4026_v52 }
 0x781   : > { %v1835_v5 = vsub.f32 1.0, %v1834_v62  ;;  %v1746_v22 = vmul.f32 %v4018_v48, %v1745_v23  ;;  %v1797_v2 = vand.u32 2147483647, %v4026_v52  ;;  %vm1738_vm5 = vcmp.eq.f32.partialorder %v1737_v34, 8.507059e+37 }
 0x782   : > { %v1822_v56 = vadd.f32 %v3120_v25, %v1821_v57  ;;  %v3128_v30 = vpop.eup %3127  ;;  %3129 = vrcp.f32 %v4063_v53  ;;  %vm1749_vm6 = vweird.f32 %v4018_v48  ;;  %vm1793_vm7 = vweird.f32 %v4026_v52 }
 0x783   : > { %v1836_v18 = vmul.f32 %v3124_v0, %v1835_v5  ;;  %v1789_v9 = vmul.f32 %v3128_v30, %v4026_v52  ;;  %vm1794_vm4 = vweird.f32 %v3128_v30  ;;  %v1747_v46 = vadd.f32 %v4018_v48, %v1746_v22 }
 0x784   : > { %v1826_v24 = vsel %vm1825_vm13, %v3120_v25, %v1822_v56  ;;  %v1736_v25 = vsel %vm4080_vm3, %v3994_v29, %v1732_v31  ;;  %vm1748_vm8 = vweird.f32 %v3985_v20  ;;  %v1754_v51 = vand.u32 2147483648, %v3985_v20  ;;  %vm1795_vm9 = vmor %vm1793_vm7, %vm1794_vm4 }
 0x785   : > { %v1831_v21 = vsel %vm4050_vm12, %v1830_v17, %v1826_v24  ;;  %v1837_v27 = vadd.f32 %v3124_v0, %v1836_v18  ;;  %v1790_v41 = vsub.f32 1.0, %v1789_v9  ;;  %vm4096_vm10 = vmor %vm1748_vm8, %vm1749_vm6  ;;  %v1752_v1 = vand.u32 2147483647, %v3985_v20 }
 0x786   : > { %v1854_v32 = vmul.f32 %v1831_v21, %v3955_v35  ;;  %vm1798_vm11 = vcmp.eq.f32.partialorder %v1797_v2, 8.507059e+37  ;;  %v1751_v59 = vsel %vm4096_vm10, %v4018_v48, %v1747_v46  ;;  %v1814_v62 = vand.u32 2147483648, %v4063_v53 }
 0x787   : > { %v1841_v26 = vsel %vm1840_vm0, %v3124_v0, %v1837_v27  ;;  %v1791_v44 = vmul.f32 %v3128_v30, %v1790_v41  ;;  %v1800_v0 = vor.u32 1.1754944e-38, %v1799_v42  ;;  %v1812_v15 = vand.u32 2147483647, %v4063_v53 }
 0x788   : > { %v1858_v37 = vpack.c.bf16 %v1854_v32, %v1850_v7  ;;  %v1846_v38 = vsel %vm1843_vm2, %v1845_v33, %v1841_v26  ;;  %v3130_v45 = vpop.eup %3129  ;;  %v1755_v3 = vor.u32 1.1754944e-38, %v1754_v51  ;;  %vm1753_vm13 = vcmp.eq.f32.partialorder %v1752_v1, 8.507059e+37 }
 0x789   : > { %v1855_v40 = vmul.f32 %v1846_v38, %v3957_v36  ;;  %v1741_v36 = vsel %vm1738_vm5, %v1740_v60, %v1736_v25  ;;  %v1792_v49 = vadd.f32 %v3128_v30, %v1791_v44  ;;  %v1804_v29 = vmul.f32 %v3130_v45, %v4063_v53 }
 0x78a   : > { %2156 = vmatmul.bf16.vlgmr.msra.gmra.mxu0 %v1858_v37  ;;  %v1848_v52 = vmul.f32 %v1741_v36, %v3947_v16  ;;  %vm1809_vm12 = vweird.f32 %v3130_v45  ;;  %vm1808_vm14 = vweird.f32 %v4063_v53  ;;  %v1756_v16 = vsel %vm1753_vm13, %v1755_v3, %v1751_v59 }
 0x78b   : > { %v1859_v43 = vpack.c.bf16 %v1855_v40, %v1851_v39  ;;  %v1796_v58 = vsel %vm1795_vm9, %v3128_v30, %v1792_v49  ;;  %v1805_v11 = vsub.f32 1.0, %v1804_v29  ;;  %vm1810_vm15 = vmor %vm1808_vm14, %vm1809_vm12  ;;  %v1815_v5 = vor.u32 1.1754944e-38, %v1814_v62 }
 0x78c   : > { %v1801_v61 = vsel %vm1798_vm11, %v1800_v0, %v1796_v58  ;;  %vm1813_vm0 = vcmp.eq.f32.partialorder %v1812_v15, 8.507059e+37 }
 0x78d   : > { %2170 = vmatmul.bf16.vlgmr.msrb.gmra.mxu1 %v1859_v43  ;;  %v1852_v63 = vmul.f32 %v1801_v61, %v3963_v8  ;;  %v1806_v57 = vmul.f32 %v3130_v45, %v1805_v11  ;;  %v1849_v8 = vmul.f32 %v1756_v16, %v3951_v28 }
 0x78f   : > { %v1856_v20 = vpack.c.bf16 %v1852_v63, %v1848_v52  ;;  %v1807_v4 = vadd.f32 %v3130_v45, %v1806_v57 }
 0x791   : > { %v1811_v6 = vsel %vm1810_vm15, %v3130_v45, %v1807_v4  ;;  %2128 = vmatmul.bf16.vlgmr.msra.gmra.mxu2 %v1856_v20 }
 0x792   : > { %v1816_v48 = vsel %vm1813_vm0, %v1815_v5, %v1811_v6 }
 0x793   : > { %v1853_v10 = vmul.f32 %v1816_v48, %v3981_v12 }
 0x795   : > { %v1857_v56 = vpack.c.bf16 %v1853_v10, %v1849_v8 }
 0x797   : > { %2142 = vmatmul.bf16.vlgmr.msrb.gmra.mxu3 %v1857_v56 }
 0x807   : > { %v2157_v18 = vpop.f32.mrf.mxu0 }
 0x80a   : > { %v2171_v24 = vpop.f32.mrf.mxu1 }
 0x80f   : > { %v2159_v30 = vpop.f32.mrf.mxu0 }
 0x812   : > { %v2173_v32 = vpop.f32.mrf.mxu1 }
 0x814   : > { %v2129_v14 = vpop.f32.mrf.mxu2 }
 0x815   : > { %v2130_v17 = vadd.f32 %v3056_v54, %v2129_v14 }
 0x81a   : > { %v2143_v19 = vpop.f32.mrf.mxu3 }
 0x81b   : > { %v2144_v23 = vadd.f32 %v2143_v19, %v2130_v17 }
 0x81c   : > { %v2131_v53 = vpop.f32.mrf.mxu2 }
 0x81d   : > { %v2158_v7 = vadd.f32 %v2157_v18, %v2144_v23  ;;  %v2132_v21 = vadd.f32 %v3056_v54, %v2131_v53 }
 0x81f   : > { %v2172_v13 = vadd.f32 %v2171_v24, %v2158_v7 }
 0x821   : > { %v2176_v28 = vadd.f32 %v2172_v13, %v3906_v47 }
 0x822   : > { %v2145_v12 = vpop.f32.mrf.mxu3 }
 0x823   : > { %2178 = vst [vmem:[%s628_s21] sm:$0xff] %v2176_v28  ;;  %v2146_v27 = vadd.f32 %v2145_v12, %v2132_v21 }
 0x825   : > { %v2160_v31 = vadd.f32 %v2159_v30, %v2146_v27 }
 0x827   : > { %v2174_v33 = vadd.f32 %v2173_v32, %v2160_v31 }
 0x829   : > { %v2177_v47 = vadd.f32 %v2174_v33, %v3910_v50 }
 0x82b   : > { %2179 = vst [vmem:[%s628_s21 + $0x8] sm:$0xff] %v2177_v47 }
 0x82c   : > { %3458 = shalt.err (!%p3455_p9)
}
 0x82d   : > { %s3540_s22 = smov 128   ;;  %s3541_s21 = smov 8  }
 0x82e   : > { %2923 = dma.vmem_to_hbm [thread:$0]  (%p3732_p13), %s2194_s8, 256, %s2196_s25, %s2181_s20, %s3540_s22, %s3540_s22, %s3541_s21  }
 0x82f PF: > { %s2210_s27 = sand.u32 1, %s3505_s29   ;;  %p4209_p10 = scmp.ge.s32.totalorder %s3517_s16, 2 }
 0x830   : > { %s2211_s23 = scalar_lea.sflag [#allocation4], %s2210_s27 }
 0x831   : > { %p2958_p11 = pnand %p4209_p10, %p3737_p4 }
 0x833   : > { %p2959_p0 = pneg %p2958_p11 }
 0x835   : > { %3500 = dma.done.wait (%p2959_p0), %s2211_s23, 256  }
 0x836   : > { %3502 = vsyncadd (%p2959_p0), %s2211_s23, 4294967040  ;;  %p32_p2 = scmp.ge.s32.totalorder %s3712_s13, 4   ;;  %s4210_s29 = smov %s3509_s30 }
 0x837   : > { %s4211_s30 = smov %s3513_s15  ;;  %s4212_s15 = smov %s3724_s26 }
 0x838   : > { %s4213_s16 = smov %s3712_s13  ;;  %34 = sbr.rel (!%p32_p2) target bundleno = 19 (0x13), region = 157 }
 0x83d   :  { %2217 = vsyncpa [#allocation3], 1 }
 0x83e   :  { %2219 = vsyncpa [#allocation3 + $0x1], 1 }
 0x83f   :  { %2220 = vsyncpa [#allocation6], 1 }
 0x840   :  { %2221 = vsyncpa [#allocation9], 1 }
 0x841   :  { %2222 = vsyncpa [#allocation12], 1 }
 0x842   :  { %2223 = vsyncpa [#allocation15], 1 }
 0x843   :  { %2224 = vsyncpa [#allocation18], 1 }
 0x844   :  { %2225 = vsyncpa [#allocation4], 1 }
 0x845   :  { %2227 = vsyncpa [#allocation4 + $0x1], 1 }

</bundles_post_ra>
